<compile_context>
chip_gen: v7x
topology: tpu7x:2x2x1
jax: 0.10.0
libtpu: 0.0.40
codegen_flags: <defaults>
</compile_context>

<pallas_src>
import functools

import numpy as np
import jax
import jax.numpy as jnp
from jax.experimental import pallas as pl
from jax.experimental.pallas import tpu as pltpu


# --------------------------------------------------------------------------- #
# Kernel
# --------------------------------------------------------------------------- #
def _mha_kernel(n_supps, pad_size,
                q_ref, kv_ref, lens_ref, hbd_ref,
                wq_ref, wk_ref, wv_ref, wo_ref,
                bq_ref, bk_ref, bv_ref, bo_ref,
                out_ref, attn_ref):
    f32 = jnp.float32
    TB, E = q_ref.shape
    L = n_supps * pad_size

    # ---- projections -------------------------------------------------------
    # Query projection; 1/sqrt(head_dim) already folded into wq/bq.
    q = jnp.dot(q_ref[...], wq_ref[...], preferred_element_type=f32) + bq_ref[...]   # [TB, E]

    # Key / value projections.  Support rows are DMA'd as f32 and cast to bf16
    # here (MXU-native operands, f32 accumulation); separate matmuls so each
    # result is already a clean (TB*L, E) slab (no lane slicing / relayouts).
    rows = kv_ref[...].astype(jnp.bfloat16)                                           # [TB*L, S]
    k = jnp.dot(rows, wk_ref[...], preferred_element_type=f32) + bk_ref[...]          # [TB*L, E]
    v = jnp.dot(rows, wv_ref[...], preferred_element_type=f32) + bv_ref[...]          # [TB*L, E]
    k3 = k.reshape(TB, L, E)
    v3 = v.reshape(TB, L, E)

    # ---- per-head scores, head-replicated along the E lane axis -------------
    # hbd[e, e'] = 1 iff e, e' belong to the same head: one MXU pass both sums
    # each head's hd lanes and replicates the score over those lanes, which is
    # exactly the layout needed for the value mixing below.
    prod = q[:, None, :] * k3                                                          # [TB, L, E]
    scores = jnp.dot(prod.reshape(TB * L, E), hbd_ref[...],
                     preferred_element_type=f32).reshape(TB, L, E)

    # ---- key-padding mask built in-kernel from per-series lengths -----------
    # Key l belongs to support series s = l // pad_size of this query; it is
    # valid iff (l - s*pad_size) < lens[b, s].
    lens = lens_ref[...]                                                               # [TB, n_supps] int32
    pos = jax.lax.broadcasted_iota(jnp.int32, (TB, L, 1), 1)
    valid = jnp.zeros((TB, L, 1), dtype=jnp.bool_)
    for s in range(n_supps):                                                           # n_supps is small/static
        seg_len = lens[:, s:s + 1][:, :, None]                                         # [TB, 1, 1]
        valid = valid | ((pos >= s * pad_size) & (pos - s * pad_size < seg_len))
    scores = scores + jnp.where(valid, jnp.float32(0.0), jnp.float32(-1e30))           # bcast over E lanes

    # ---- segmented softmax over L (per query, per head); f32 math -----------
    m = jnp.max(scores, axis=1, keepdims=True)                                         # [TB, 1, E]
    e = jnp.exp(scores - m)
    z = jnp.sum(e, axis=1, keepdims=True)
    p = e * pl.reciprocal(z, approx=True)                                              # [TB, L, E]

    # ---- context + output projection ----------------------------------------
    ctx = jnp.sum(p * v3, axis=1)                                                      # [TB, E]
    out_ref[...] = jnp.dot(ctx, wo_ref[...], preferred_element_type=f32) + bo_ref[...]

    # Head-averaged attention: each head's score is replicated hd times along the
    # E lanes, so mean over heads == lane-sum * (1/E).
    attn_ref[...] = jnp.sum(p, axis=-1) * (1.0 / E)                                    # [TB, L]


# --------------------------------------------------------------------------- #
# One-time parameter preparation (hoisted out of the forward path)
# --------------------------------------------------------------------------- #
def prepare_params(params, q_size, num_heads):
    hd = q_size // num_heads
    scale = 1.0 / float(np.sqrt(hd))
    r = np.arange(q_size)
    hbd = (r[:, None] // hd == r[None, :] // hd).astype(np.float32)                    # [E, E]
    return {
        "wq": (params["wq"] * scale).astype(jnp.float32),
        "bq": (params["bq"] * scale).astype(jnp.float32),
        "wk": params["wk"].astype(jnp.bfloat16),
        "wv": params["wv"].astype(jnp.bfloat16),
        "bk": params["bk"].astype(jnp.float32),
        "bv": params["bv"].astype(jnp.float32),
        "wo": params["wo"].astype(jnp.float32),
        "bo": params["bo"].astype(jnp.float32),
        "hbd": jnp.asarray(hbd),
    }


# --------------------------------------------------------------------------- #
# Tiling heuristic (generation-aware VMEM budget)
# --------------------------------------------------------------------------- #
def _tpu_vmem_bytes():
    try:
        return int(pltpu.get_tpu_info().vmem_capacity_bytes)
    except Exception:
        return 64 << 20                         # conservative (v7x-class) default


def _pick_tile_and_vmem(q_batch, L, S, E):
    vmem_phys = _tpu_vmem_bytes()
    # Total working-set budget for the streamed tile: smaller on 64 MiB (v7x)
    # parts, larger on 128 MiB (v5e/v6e) parts.
    budget = (24 << 20) if vmem_phys <= (64 << 20) else (48 << 20)
    # Per batch-row cost estimate: double-buffered inputs (kvf f32 + q + lane-
    # padded lens tile) + ~5 live (L, E) f32 body temporaries + bf16 kvf copy.
    per_row = 2 * (L * S * 4 + E * 4 + 512) + 5 * L * E * 4 + L * S * 2
    tb = q_batch
    if q_batch % 8 == 0:
        tb = 8
        while (q_batch % (tb * 2) == 0
               and q_batch // (tb * 2) >= 4      # keep >=4 steps: >=2 per TC on v7x
               and (tb * 2) * per_row <= budget):
            tb *= 2
    est = tb * per_row + (8 << 20)               # + resident weights / slack
    vmem_limit = int(min(max(est, 32 << 20), int(vmem_phys * 0.9)))
    return tb, vmem_limit


# --------------------------------------------------------------------------- #
# Forward wrapper
# --------------------------------------------------------------------------- #
def multihead_supps_query_attention(supps_sequences, supps_lengths, n_supps,
                                    query_sequences, prepped, num_heads):
    supps_batch, pad_size, supps_size = supps_sequences.shape
    q_batch, q_size = query_sequences.shape
    assert supps_batch == q_batch * n_supps
    assert q_size % num_heads == 0
    L = n_supps * pad_size

    # Metadata-only reshapes (no extra HBM passes in the forward path).
    kvf = supps_sequences.reshape(q_batch * L, supps_size)
    lens2 = supps_lengths.reshape(q_batch, n_supps).astype(jnp.int32)
    qf = query_sequences.astype(jnp.float32)

    TB, vmem_limit = _pick_tile_and_vmem(q_batch, L, supps_size, q_size)
    grid = (q_batch // TB,)

    in_specs = [
        pl.BlockSpec((TB, q_size), lambda i: (i, 0)),               # query tile
        pl.BlockSpec((TB * L, supps_size), lambda i: (i, 0)),       # support rows tile (f32)
        pl.BlockSpec((TB, n_supps), lambda i: (i, 0)),              # per-series lengths tile
        pl.BlockSpec((q_size, q_size), lambda i: (0, 0)),           # head block-diag (resident)
        pl.BlockSpec((q_size, q_size), lambda i: (0, 0)),           # wq (resident)
        pl.BlockSpec((supps_size, q_size), lambda i: (0, 0)),       # wk (resident, bf16)
        pl.BlockSpec((supps_size, q_size), lambda i: (0, 0)),       # wv (resident, bf16)
        pl.BlockSpec((q_size, q_size), lambda i: (0, 0)),           # wo (resident)
        pl.BlockSpec((1, q_size), lambda i: (0, 0)),                # bq
        pl.BlockSpec((1, q_size), lambda i: (0, 0)),                # bk
        pl.BlockSpec((1, q_size), lambda i: (0, 0)),                # bv
        pl.BlockSpec((1, q_size), lambda i: (0, 0)),                # bo
    ]
    out_specs = [
        pl.BlockSpec((TB, q_size), lambda i: (i, 0)),
        pl.BlockSpec((TB, L), lambda i: (i, 0)),
    ]
    out_shapes = (jax.ShapeDtypeStruct((q_batch, q_size), jnp.float32),
                  jax.ShapeDtypeStruct((q_batch, L), jnp.float32))

    kernel = functools.partial(_mha_kernel, n_supps, pad_size)
    out, attn = pl.pallas_call(
        kernel,
        out_shape=out_shapes,
        grid_spec=pltpu.PrefetchScalarGridSpec(
            num_scalar_prefetch=0,
            grid=grid,
            in_specs=in_specs,
            out_specs=out_specs),
        compiler_params=pltpu.CompilerParams(
            dimension_semantics=("parallel",),
            vmem_limit_bytes=vmem_limit),
    )(qf, kvf, lens2,
      prepped["hbd"], prepped["wq"], prepped["wk"], prepped["wv"], prepped["wo"],
      prepped["bq"], prepped["bk"], prepped["bv"], prepped["bo"])
    return out, attn.reshape(q_batch, 1, L)


# --------------------------------------------------------------------------- #
# Pure-JAX mirror of torch nn.MultiheadAttention (kdim=vdim=supps_size)
# --------------------------------------------------------------------------- #
def reference(query, supps_sequences, supps_lengths, n_supps, params, num_heads):
    supps_batch, pad_size, S = supps_sequences.shape
    B, E = query.shape
    L = n_supps * pad_size
    hd = E // num_heads
    support_set = supps_sequences.reshape(B, L, S)
    valid = jnp.arange(pad_size)[None, :] < supps_lengths[:, None]
    add_mask = jnp.where((~valid).reshape(B, L), -1e30, 0.0)

    q = query @ params["wq"] + params["bq"][0]
    k = jnp.einsum("bls,se->ble", support_set, params["wk"]) + params["bk"][0]
    v = jnp.einsum("bls,se->ble", support_set, params["wv"]) + params["bv"][0]
    qh = q.reshape(B, num_heads, hd) / np.sqrt(hd)
    kh = k.reshape(B, L, num_heads, hd)
    vh = v.reshape(B, L, num_heads, hd)
    scores = jnp.einsum("bhd,blhd->bhl", qh, kh) + add_mask[:, None, :]
    p = jax.nn.softmax(scores, axis=-1)
    ctx = jnp.einsum("bhl,blhd->bhd", p, vh).reshape(B, E)
    out = ctx @ params["wo"] + params["bo"][0]
    attn = jnp.mean(p, axis=1)[:, None, :]
    return out, attn


if __name__ == "__main__":
    # Small shapes consistent with the module; q_batch chosen so the batch grid
    # has 2 steps (TB=8).
    q_size = 32          # embed_dim
    supps_size = 16      # kdim = vdim
    num_heads = 4
    n_supps = 2          # support set size per query
    pad_size = 8         # padded support sequence length
    q_batch = 16
    supps_batch = q_batch * n_supps

    key = jax.random.PRNGKey(0)
    ks = jax.random.split(key, 11)
    query_seq = jax.random.normal(ks[0], (q_batch, q_size), dtype=jnp.float32)
    # Pre-round the support data and K/V weights to bf16-representable values so
    # the f32 reference and the bf16-matmul kernel see identical operands.
    supps_seq = jax.random.normal(
        ks[1], (supps_batch, pad_size, supps_size), dtype=jnp.float32
    ).astype(jnp.bfloat16).astype(jnp.float32)
    supps_len = jax.random.randint(ks[2], (supps_batch,), 1, pad_size + 1).astype(jnp.int32)

    def _w(k, shape):
        return 0.1 * jax.random.normal(k, shape, dtype=jnp.float32)

    params = {
        "wq": _w(ks[3], (q_size, q_size)),
        "wk": _w(ks[4], (supps_size, q_size)).astype(jnp.bfloat16).astype(jnp.float32),
        "wv": _w(ks[5], (supps_size, q_size)).astype(jnp.bfloat16).astype(jnp.float32),
        "wo": _w(ks[6], (q_size, q_size)),
        "bq": _w(ks[7], (1, q_size)),
        "bk": _w(ks[8], (1, q_size)),
        "bv": _w(ks[9], (1, q_size)),
        "bo": _w(ks[10], (1, q_size)),
    }

    # One-time parameter prep (scale fold, bf16 K/V weights, head block-diag).
    prepped = prepare_params(params, q_size, num_heads)

    values, attention = multihead_supps_query_attention(
        supps_seq, supps_len, n_supps, query_seq, prepped, num_heads)
    values, attention = jax.block_until_ready((values, attention))

    ref_values, ref_attention = reference(
        query_seq, supps_seq, supps_len, n_supps, params, num_heads)
    np.testing.assert_allclose(np.asarray(values), np.asarray(ref_values),
                               rtol=1e-2, atol=2e-3)
    np.testing.assert_allclose(np.asarray(attention), np.asarray(ref_attention),
                               rtol=1e-2, atol=2e-3)
    assert values.shape == (q_batch, q_size)
    assert attention.shape == (q_batch, 1, n_supps * pad_size)
    print("KERNEL_OK")
</pallas_src>

<mosaic_0001>
module attributes {stable_mosaic.version = 11 : i64} {
  func.func @_mha_kernel(%arg0: i32, %arg1: memref<8x32xf32, #tpu.memory_space<vmem>>, %arg2: memref<128x16xf32, #tpu.memory_space<vmem>>, %arg3: memref<8x2xi32, #tpu.memory_space<vmem>>, %arg4: memref<32x32xf32, #tpu.memory_space<vmem>>, %arg5: memref<32x32xf32, #tpu.memory_space<vmem>>, %arg6: memref<16x32xbf16, #tpu.memory_space<vmem>>, %arg7: memref<16x32xbf16, #tpu.memory_space<vmem>>, %arg8: memref<32x32xf32, #tpu.memory_space<vmem>>, %arg9: memref<1x32xf32, #tpu.memory_space<vmem>>, %arg10: memref<1x32xf32, #tpu.memory_space<vmem>>, %arg11: memref<1x32xf32, #tpu.memory_space<vmem>>, %arg12: memref<1x32xf32, #tpu.memory_space<vmem>>, %arg13: memref<8x32xf32, #tpu.memory_space<vmem>>, %arg14: memref<8x16xf32, #tpu.memory_space<vmem>>) attributes {dimension_semantics = [#tpu.dimension_semantics<parallel>], iteration_bounds = array<i64: 2>, scalar_prefetch = 0 : i64, scratch_operands = 0 : i64, tpu.core_type = #tpu.core_type<tc>, window_params = [{transform_indices = @transform_0, window_bounds = array<i64: 8, 32>}, {transform_indices = @transform_1, window_bounds = array<i64: 128, 16>}, {transform_indices = @transform_2, window_bounds = array<i64: 8, 2>}, {pipeline_mode = #tpu.pipeline_mode<synchronous>, transform_indices = @transform_3, window_bounds = array<i64: 32, 32>}, {pipeline_mode = #tpu.pipeline_mode<synchronous>, transform_indices = @transform_4, window_bounds = array<i64: 32, 32>}, {pipeline_mode = #tpu.pipeline_mode<synchronous>, transform_indices = @transform_5, window_bounds = array<i64: 16, 32>}, {pipeline_mode = #tpu.pipeline_mode<synchronous>, transform_indices = @transform_6, window_bounds = array<i64: 16, 32>}, {pipeline_mode = #tpu.pipeline_mode<synchronous>, transform_indices = @transform_7, window_bounds = array<i64: 32, 32>}, {pipeline_mode = #tpu.pipeline_mode<synchronous>, transform_indices = @transform_8, window_bounds = array<i64: 1, 32>}, {pipeline_mode = #tpu.pipeline_mode<synchronous>, transform_indices = @transform_9, window_bounds = array<i64: 1, 32>}, {pipeline_mode = #tpu.pipeline_mode<synchronous>, transform_indices = @transform_10, window_bounds = array<i64: 1, 32>}, {pipeline_mode = #tpu.pipeline_mode<synchronous>, transform_indices = @transform_11, window_bounds = array<i64: 1, 32>}, {transform_indices = @transform_12, window_bounds = array<i64: 8, 32>}, {transform_indices = @transform_13, window_bounds = array<i64: 8, 16>}]} {
    %c0 = arith.constant 0 : index
    %c0_0 = arith.constant 0 : index
    %0 = vector.load %arg1[%c0, %c0_0] : memref<8x32xf32, #tpu.memory_space<vmem>>, vector<8x32xf32>
    %c0_1 = arith.constant 0 : index
    %c0_2 = arith.constant 0 : index
    %1 = vector.load %arg5[%c0_1, %c0_2] : memref<32x32xf32, #tpu.memory_space<vmem>>, vector<32x32xf32>
    %cst = arith.constant dense<0.000000e+00> : vector<8x32xf32>
    %2 = tpu.matmul %0, %1, %cst {dimension_numbers = #tpu.dot_dimension_numbers<[1], [0], [0], [1], [0, 0, 1, 1], [], []>} : vector<8x32xf32>, vector<32x32xf32>, vector<8x32xf32> -> vector<8x32xf32>
    %c0_3 = arith.constant 0 : index
    %c0_4 = arith.constant 0 : index
    %3 = vector.load %arg9[%c0_3, %c0_4] : memref<1x32xf32, #tpu.memory_space<vmem>>, vector<1x32xf32>
    %4 = vector.broadcast %3 : vector<1x32xf32> to vector<8x32xf32>
    %5 = arith.addf %2, %4 : vector<8x32xf32>
    %c0_5 = arith.constant 0 : index
    %c0_6 = arith.constant 0 : index
    %6 = vector.load %arg2[%c0_5, %c0_6] : memref<128x16xf32, #tpu.memory_space<vmem>>, vector<128x16xf32>
    %7 = arith.truncf %6 : vector<128x16xf32> to vector<128x16xbf16>
    %c0_7 = arith.constant 0 : index
    %c0_8 = arith.constant 0 : index
    %8 = vector.load %arg6[%c0_7, %c0_8] : memref<16x32xbf16, #tpu.memory_space<vmem>>, vector<16x32xbf16>
    %cst_9 = arith.constant dense<0.000000e+00> : vector<128x32xf32>
    %9 = tpu.matmul %7, %8, %cst_9 {dimension_numbers = #tpu.dot_dimension_numbers<[1], [0], [0], [1], [0, 0, 1, 1], [], []>} : vector<128x16xbf16>, vector<16x32xbf16>, vector<128x32xf32> -> vector<128x32xf32>
    %c0_10 = arith.constant 0 : index
    %c0_11 = arith.constant 0 : index
    %10 = vector.load %arg10[%c0_10, %c0_11] : memref<1x32xf32, #tpu.memory_space<vmem>>, vector<1x32xf32>
    %11 = vector.broadcast %10 : vector<1x32xf32> to vector<128x32xf32>
    %12 = arith.addf %9, %11 : vector<128x32xf32>
    %c0_12 = arith.constant 0 : index
    %c0_13 = arith.constant 0 : index
    %13 = vector.load %arg7[%c0_12, %c0_13] : memref<16x32xbf16, #tpu.memory_space<vmem>>, vector<16x32xbf16>
    %cst_14 = arith.constant dense<0.000000e+00> : vector<128x32xf32>
    %14 = tpu.matmul %7, %13, %cst_14 {dimension_numbers = #tpu.dot_dimension_numbers<[1], [0], [0], [1], [0, 0, 1, 1], [], []>} : vector<128x16xbf16>, vector<16x32xbf16>, vector<128x32xf32> -> vector<128x32xf32>
    %c0_15 = arith.constant 0 : index
    %c0_16 = arith.constant 0 : index
    %15 = vector.load %arg11[%c0_15, %c0_16] : memref<1x32xf32, #tpu.memory_space<vmem>>, vector<1x32xf32>
    %16 = vector.broadcast %15 : vector<1x32xf32> to vector<128x32xf32>
    %17 = arith.addf %14, %16 : vector<128x32xf32>
    %18 = vector.shape_cast %12 : vector<128x32xf32> to vector<8x16x32xf32>
    %19 = vector.shape_cast %17 : vector<128x32xf32> to vector<8x16x32xf32>
    %20 = vector.shape_cast %5 : vector<8x32xf32> to vector<8x1x32xf32>
    %21 = vector.broadcast %20 : vector<8x1x32xf32> to vector<8x16x32xf32>
    %22 = arith.mulf %21, %18 : vector<8x16x32xf32>
    %23 = vector.shape_cast %22 : vector<8x16x32xf32> to vector<128x32xf32>
    %c0_17 = arith.constant 0 : index
    %c0_18 = arith.constant 0 : index
    %24 = vector.load %arg4[%c0_17, %c0_18] : memref<32x32xf32, #tpu.memory_space<vmem>>, vector<32x32xf32>
    %cst_19 = arith.constant dense<0.000000e+00> : vector<128x32xf32>
    %25 = tpu.matmul %23, %24, %cst_19 {dimension_numbers = #tpu.dot_dimension_numbers<[1], [0], [0], [1], [0, 0, 1, 1], [], []>} : vector<128x32xf32>, vector<32x32xf32>, vector<128x32xf32> -> vector<128x32xf32>
    %26 = vector.shape_cast %25 : vector<128x32xf32> to vector<8x16x32xf32>
    %c0_20 = arith.constant 0 : index
    %c0_21 = arith.constant 0 : index
    %27 = vector.load %arg3[%c0_20, %c0_21] : memref<8x2xi32, #tpu.memory_space<vmem>>, vector<8x2xi32>
    %28 = tpu.iota {dimensions = array<i32: 1>} : vector<8x16x1xi32>
    %false = arith.constant false
    %29 = vector.broadcast %false : i1 to vector<8x16x1xi1>
    %30 = vector.extract_strided_slice %27 {offsets = [0, 0], sizes = [8, 1], strides = [1, 1]} : vector<8x2xi32> to vector<8x1xi32>
    %31 = vector.shape_cast %30 : vector<8x1xi32> to vector<8x1x1xi32>
    %c0_i32 = arith.constant 0 : i32
    %32 = vector.broadcast %c0_i32 : i32 to vector<8x16x1xi32>
    %33 = arith.cmpi sge, %28, %32 : vector<8x16x1xi32>
    %c0_i32_22 = arith.constant 0 : i32
    %34 = vector.broadcast %c0_i32_22 : i32 to vector<8x16x1xi32>
    %35 = arith.subi %28, %34 : vector<8x16x1xi32>
    %36 = vector.broadcast %31 : vector<8x1x1xi32> to vector<8x16x1xi32>
    %37 = arith.cmpi slt, %35, %36 : vector<8x16x1xi32>
    %38 = arith.andi %33, %37 : vector<8x16x1xi1>
    %39 = arith.ori %29, %38 : vector<8x16x1xi1>
    %40 = vector.extract_strided_slice %27 {offsets = [0, 1], sizes = [8, 1], strides = [1, 1]} : vector<8x2xi32> to vector<8x1xi32>
    %41 = vector.shape_cast %40 : vector<8x1xi32> to vector<8x1x1xi32>
    %c8_i32 = arith.constant 8 : i32
    %42 = vector.broadcast %c8_i32 : i32 to vector<8x16x1xi32>
    %43 = arith.cmpi sge, %28, %42 : vector<8x16x1xi32>
    %c8_i32_23 = arith.constant 8 : i32
    %44 = vector.broadcast %c8_i32_23 : i32 to vector<8x16x1xi32>
    %45 = arith.subi %28, %44 : vector<8x16x1xi32>
    %46 = vector.broadcast %41 : vector<8x1x1xi32> to vector<8x16x1xi32>
    %47 = arith.cmpi slt, %45, %46 : vector<8x16x1xi32>
    %48 = arith.andi %43, %47 : vector<8x16x1xi1>
    %49 = arith.ori %39, %48 : vector<8x16x1xi1>
    %cst_24 = arith.constant 0.000000e+00 : f32
    %cst_25 = arith.constant -1.000000e+30 : f32
    %50 = vector.broadcast %cst_24 : f32 to vector<8x16x1xf32>
    %51 = vector.broadcast %cst_25 : f32 to vector<8x16x1xf32>
    %52 = arith.select %49, %50, %51 : vector<8x16x1xi1>, vector<8x16x1xf32>
    %53 = vector.broadcast %52 : vector<8x16x1xf32> to vector<8x16x32xf32>
    %54 = arith.addf %26, %53 : vector<8x16x32xf32>
    %cst_26 = arith.constant dense<0xFF800000> : vector<8x32xf32>
    %55 = vector.multi_reduction <maximumf>, %54, %cst_26 [1] : vector<8x16x32xf32> to vector<8x32xf32>
    %56 = vector.shape_cast %55 : vector<8x32xf32> to vector<8x1x32xf32>
    %57 = vector.broadcast %56 : vector<8x1x32xf32> to vector<8x16x32xf32>
    %58 = arith.subf %54, %57 : vector<8x16x32xf32>
    %59 = math.exp %58 : vector<8x16x32xf32>
    %cst_27 = arith.constant dense<0.000000e+00> : vector<8x32xf32>
    %60 = vector.multi_reduction <add>, %59, %cst_27 [1] : vector<8x16x32xf32> to vector<8x32xf32>
    %61 = vector.shape_cast %60 : vector<8x32xf32> to vector<8x1x32xf32>
    %62 = tpu.reciprocal %61 {approx = true} : vector<8x1x32xf32> -> vector<8x1x32xf32>
    %63 = vector.broadcast %62 : vector<8x1x32xf32> to vector<8x16x32xf32>
    %64 = arith.mulf %59, %63 : vector<8x16x32xf32>
    %65 = arith.mulf %64, %19 : vector<8x16x32xf32>
    %cst_28 = arith.constant dense<0.000000e+00> : vector<8x32xf32>
    %66 = vector.multi_reduction <add>, %65, %cst_28 [1] : vector<8x16x32xf32> to vector<8x32xf32>
    %c0_29 = arith.constant 0 : index
    %c0_30 = arith.constant 0 : index
    %67 = vector.load %arg8[%c0_29, %c0_30] : memref<32x32xf32, #tpu.memory_space<vmem>>, vector<32x32xf32>
    %cst_31 = arith.constant dense<0.000000e+00> : vector<8x32xf32>
    %68 = tpu.matmul %66, %67, %cst_31 {dimension_numbers = #tpu.dot_dimension_numbers<[1], [0], [0], [1], [0, 0, 1, 1], [], []>} : vector<8x32xf32>, vector<32x32xf32>, vector<8x32xf32> -> vector<8x32xf32>
    %c0_32 = arith.constant 0 : index
    %c0_33 = arith.constant 0 : index
    %69 = vector.load %arg12[%c0_32, %c0_33] : memref<1x32xf32, #tpu.memory_space<vmem>>, vector<1x32xf32>
    %70 = vector.broadcast %69 : vector<1x32xf32> to vector<8x32xf32>
    %71 = arith.addf %68, %70 : vector<8x32xf32>
    %c0_34 = arith.constant 0 : index
    %c0_35 = arith.constant 0 : index
    %72 = vector.load %arg13[%c0_34, %c0_35] : memref<8x32xf32, #tpu.memory_space<vmem>>, vector<8x32xf32>
    tpu.vector_store %arg13[%c0_34, %c0_35], %71 {strides = array<i32>} : memref<8x32xf32, #tpu.memory_space<vmem>>, vector<8x32xf32>,
    %cst_36 = arith.constant dense<0.000000e+00> : vector<8x16xf32>
    %73 = vector.multi_reduction <add>, %64, %cst_36 [2] : vector<8x16x32xf32> to vector<8x16xf32>
    %cst_37 = arith.constant 3.125000e-02 : f32
    %74 = vector.broadcast %cst_37 : f32 to vector<8x16xf32>
    %75 = arith.mulf %73, %74 : vector<8x16xf32>
    %c0_38 = arith.constant 0 : index
    %c0_39 = arith.constant 0 : index
    %76 = vector.load %arg14[%c0_38, %c0_39] : memref<8x16xf32, #tpu.memory_space<vmem>>, vector<8x16xf32>
    tpu.vector_store %arg14[%c0_38, %c0_39], %75 {strides = array<i32>} : memref<8x16xf32, #tpu.memory_space<vmem>>, vector<8x16xf32>,
    return
  }
  func.func @transform_0(%arg0: i32) -> (i32, i32) {
    %c0_i32 = arith.constant 0 : i32
    %c0_i32_0 = arith.constant 0 : i32
    return %arg0, %c0_i32 : i32, i32
  }
  func.func @transform_1(%arg0: i32) -> (i32, i32) {
    %c0_i32 = arith.constant 0 : i32
    %c0_i32_0 = arith.constant 0 : i32
    return %arg0, %c0_i32 : i32, i32
  }
  func.func @transform_2(%arg0: i32) -> (i32, i32) {
    %c0_i32 = arith.constant 0 : i32
    %c0_i32_0 = arith.constant 0 : i32
    return %arg0, %c0_i32 : i32, i32
  }
  func.func @transform_3(%arg0: i32) -> (i32, i32) {
    %c0_i32 = arith.constant 0 : i32
    %c0_i32_0 = arith.constant 0 : i32
    %c0_i32_1 = arith.constant 0 : i32
    return %c0_i32, %c0_i32_0 : i32, i32
  }
  func.func @transform_4(%arg0: i32) -> (i32, i32) {
    %c0_i32 = arith.constant 0 : i32
    %c0_i32_0 = arith.constant 0 : i32
    %c0_i32_1 = arith.constant 0 : i32
    return %c0_i32, %c0_i32_0 : i32, i32
  }
  func.func @transform_5(%arg0: i32) -> (i32, i32) {
    %c0_i32 = arith.constant 0 : i32
    %c0_i32_0 = arith.constant 0 : i32
    %c0_i32_1 = arith.constant 0 : i32
    return %c0_i32, %c0_i32_0 : i32, i32
  }
  func.func @transform_6(%arg0: i32) -> (i32, i32) {
    %c0_i32 = arith.constant 0 : i32
    %c0_i32_0 = arith.constant 0 : i32
    %c0_i32_1 = arith.constant 0 : i32
    return %c0_i32, %c0_i32_0 : i32, i32
  }
  func.func @transform_7(%arg0: i32) -> (i32, i32) {
    %c0_i32 = arith.constant 0 : i32
    %c0_i32_0 = arith.constant 0 : i32
    %c0_i32_1 = arith.constant 0 : i32
    return %c0_i32, %c0_i32_0 : i32, i32
  }
  func.func @transform_8(%arg0: i32) -> (i32, i32) {
    %c0_i32 = arith.constant 0 : i32
    %c0_i32_0 = arith.constant 0 : i32
    %c0_i32_1 = arith.constant 0 : i32
    return %c0_i32, %c0_i32_0 : i32, i32
  }
  func.func @transform_9(%arg0: i32) -> (i32, i32) {
    %c0_i32 = arith.constant 0 : i32
    %c0_i32_0 = arith.constant 0 : i32
    %c0_i32_1 = arith.constant 0 : i32
    return %c0_i32, %c0_i32_0 : i32, i32
  }
  func.func @transform_10(%arg0: i32) -> (i32, i32) {
    %c0_i32 = arith.constant 0 : i32
    %c0_i32_0 = arith.constant 0 : i32
    %c0_i32_1 = arith.constant 0 : i32
    return %c0_i32, %c0_i32_0 : i32, i32
  }
  func.func @transform_11(%arg0: i32) -> (i32, i32) {
    %c0_i32 = arith.constant 0 : i32
    %c0_i32_0 = arith.constant 0 : i32
    %c0_i32_1 = arith.constant 0 : i32
    return %c0_i32, %c0_i32_0 : i32, i32
  }
  func.func @transform_12(%arg0: i32) -> (i32, i32) {
    %c0_i32 = arith.constant 0 : i32
    %c0_i32_0 = arith.constant 0 : i32
    return %arg0, %c0_i32 : i32, i32
  }
  func.func @transform_13(%arg0: i32) -> (i32, i32) {
    %c0_i32 = arith.constant 0 : i32
    %c0_i32_0 = arith.constant 0 : i32
    return %arg0, %c0_i32 : i32, i32
  }
}

</mosaic_0001>

<bundles_post_ra>
// kernel: tpu_custom_call.1
= control target key start
LH: loop header
LB: loop body
LE: loop exit
PB: predicated region body
PF: predicated region fallthrough
CT: control target
= control target key end

     0   :  { %s3526_s0 = inlined_call_operand.vmem [shape: f32[16,32], index: 0, kind: input, shape index: {}]   ;;  %s3527_s1 = inlined_call_operand.vmem [shape: f32[256,16], index: 1, kind: input, shape index: {}]   ;;  %s3528_s2 = inlined_call_operand.vmem [shape: s32[16,2], index: 2, kind: input, shape index: {}]   ;;  %s3529_s3 = inlined_call_operand.vmem [shape: f32[32,32], index: 3, kind: input, shape index: {}]   ;;  %s3530_s4 = inlined_call_operand.vmem [shape: f32[32,32], index: 4, kind: input, shape index: {}]   ;;  %s3531_s5 = inlined_call_operand.vmem [shape: bf16[16,32], index: 5, kind: input, shape index: {}]   ;;  %s3532_s6 = inlined_call_operand.vmem [shape: bf16[16,32], index: 6, kind: input, shape index: {}]   ;;  %s3533_s7 = inlined_call_operand.vmem [shape: f32[32,32], index: 7, kind: input, shape index: {}]   ;;  %s3534_s8 = inlined_call_operand.vmem [shape: f32[1,32], index: 8, kind: input, shape index: {}]   ;;  %s3535_s9 = inlined_call_operand.vmem [shape: f32[1,32], index: 9, kind: input, shape index: {}]   ;;  %s3536_s10 = inlined_call_operand.vmem [shape: f32[1,32], index: 10, kind: input, shape index: {}]   ;;  %s3537_s11 = inlined_call_operand.vmem [shape: f32[1,32], index: 11, kind: input, shape index: {}]   ;;  %s3538_s12 = inlined_call_operand.hbm [shape: f32[16,32], index: 12, kind: output, shape index: {0}]   ;;  %s3539_s13 = inlined_call_operand.hbm [shape: f32[16,16], index: 13, kind: output, shape index: {1}]  }
   0x1   :  { %3544 = sst [smem:[#allocation9_spill]] %s3526_s0 }
   0x2   :  { %3545 = sst [smem:[#allocation10_spill]] %s3527_s1 }
   0x3   :  { %3546 = sst [smem:[#allocation11_spill]] %s3530_s4 }
   0x4   :  { %3547 = sst [smem:[#allocation12_spill]] %s3531_s5 }
   0x5   :  { %19 = vsyncpa [#allocation3], 0 }
   0x6   :  { %21 = vsyncpa [#allocation3 + $0x1], 0 }
   0x7   :  { %22 = vsyncpa [#allocation5], 0 }
   0x8   :  { %24 = vsyncpa [#allocation5 + $0x1], 0  ;;  %s2725_s25 = smov 0   ;;  %s2727_s26 = smov 0  }
   0x9   :  { %s2729_s27 = smov 0   ;;  %s2731_s28 = smov 0  }
   0xa LB: > { %s2746_s29 = sadd.s32 4294967295, %s2644_s28   ;;  %s2209_s30 = sadd.s32 4294967294, %s2644_s28   ;;  %s2644_s28 = sphi %s2731_s28, %s3644_s28   ;;  %s2640_s27 = sphi %s2729_s27, %s3643_s27   ;;  %s2636_s26 = sphi %s2727_s26, %s3642_s26   ;;  %s2632_s25 = sphi %s2725_s25, %s3641_s25  }
   0xb   : > { %s2750_s14 = sadd.s32 1, %s2644_s28   ;;  %s304_s15 = sadd.s32 1, %s2640_s27 }
   0xc   : > { %s301_s16 = ssub.s32 %s2644_s28, %s2750_s14  ;;  %p314_p0 = scmp.ne.s32.totalorder %s2640_s27, %s2636_s26 }
   0xd   : > { %p302_p1 = scmp.eq.s32.totalorder %s301_s16, 0  ;;  %p315_p2 = scmp.eq.s32.totalorder %s2746_s29, 1 }
   0xe   : > { %p320_p3 = scmp.ne.s32.totalorder %s2636_s26, %s2632_s25  ;;  %p321_p4 = scmp.eq.s32.totalorder %s2209_s30, 1 }
   0xf   : > { %s2761_s17 = scalar_select %p302_p1, %s2640_s27, %s304_s15  }
  0x10   : > { %p2763_p5 = por %p315_p2, %p314_p0  ;;  %p2767_p6 = por %p321_p4, %p320_p3 }
  0x11   : > { %3548 = sst [smem:[#allocation8_spill]] %s2761_s17  ;;  %p2212_p7 = scmp.ge.s32.totalorder %s2644_s28, 1 }
  0x12   : > { %p415_p8 = scmp.lt.s32.totalorder %s2644_s28, 3 }
  0x14   : > { %p416_p9 = pnand %p2212_p7, %p415_p8 }
  0x15   : > { %s3551_s4 = sld [smem:[#allocation11_spill]] (!%p416_p9)  ;;  %v851_v3 = vlaneseq (!%p416_p9)  ;;  %v2646_v4 = vmov (!%p416_p9), 0.0|0.0   ;;  %vm3541_vm0 = vmmov (!%p416_p9), 0   ;;  %v2648_v7 = vmov (!%p416_p9), 0.0   ;;  %p472_p10 = scmp.lt.s32.totalorder (!%p416_p9), %s2746_s29, 1  ;;  %v952_v13 = vld [vmem:[%s3529_s3] sm:$0xff] (!%p416_p9) }
  0x16   : > { %419 = sbr.rel (%p416_p9) target bundleno = 818 (0x332), region = 68  ;;  %2404 = vmatprep.subr.bf16.mxu0 (!%p416_p9), %v2646_v4  ;;  %2322 = vmatprep.mubr.msk.f32.mxu0 (!%p416_p9), %vm3541_vm0, %v2648_v7  ;;  %s3552_s5 = sld [smem:[#allocation12_spill]] (!%p416_p9)  ;;  %v2649_v10 = vmov (!%p416_p9), 1966171168   ;;  %v953_v14 = vld [vmem:[%s3529_s3 + $0x8] sm:$0xff] (!%p416_p9)  ;;  %v2650_v17 = vmov (!%p416_p9), 0  }
  0x17   : > { %s2216_s22 = sshll.u32 (!%p416_p9), %s2746_s29, 4  ;;  %v849_v11 = vunpack.c.l.s4 (!%p416_p9), %v2649_v10  ;;  %v2795_v12 = vshrl.u32 (!%p416_p9), %v851_v3, 7  ;;  %v2410_v16 = vpack.c.bf16 (!%p416_p9), %v953_v14, %v952_v13  ;;  %2498 = vset.pattern.permute.xlu1 (!%p416_p9), %v2650_v17  ;;  %s3554_s0 = sld [smem:[#allocation9_spill]] (!%p416_p9)  ;;  %vm3540_vm1 = vcmask (!%p416_p9), 261120   ;;  %2497 = vset.pattern.permute.xlu0 (!%p416_p9), %v2650_v17 }
  0x18   : > { %p2804_p11 = scmp.lt.s32.totalorder (!%p416_p9), %s2216_s22, 31  ;;  %s2651_s17 = smov (!%p416_p9), 127   ;;  %vm612_vm2 = vcmask (!%p416_p9), 130048  }
  0x19   : > { %v850_v15 = vunpack.c.0.s8 (!%p416_p9), %v849_v11  ;;  %2483 = vrot.lane.b32.xlu1 (!%p416_p9), %v2650_v17, %s2651_s17  ;;  %2478 = vrot.lane.b32.xlu0 (!%p416_p9), %v2650_v17, %s2651_s17  ;;  %v2827_v23 = vsub.s32 (!%p416_p9), 0, %v2795_v12  ;;  %s3555_s1 = sld [smem:[#allocation10_spill]] (!%p416_p9) }
  0x1b   : > { %v488_v0 = vld [vmem:[%s3551_s4] sm:$0xff] (!%p416_p9)  ;;  %v489_v1 = vld [vmem:[%s3551_s4 + $0x8] sm:$0xff] (!%p416_p9)  ;;  %v490_v2 = vld [vmem:[%s3551_s4 + $0x10] sm:$0xff] (!%p416_p9)  ;;  %v2820_v19 = vsub.s32 (!%p416_p9), %v850_v15, %v2795_v12 }
  0x1c   : > { %v2405_v5 = vpack.c.bf16 (!%p416_p9), %v489_v1, %v488_v0  ;;  %v491_v6 = vld [vmem:[%s3551_s4 + $0x18] sm:$0xff] (!%p416_p9)  ;;  %v2499_v8 = vld [vmem:[%s3552_s5] sm:$0xff] (!%p416_p9)   ;;  %v954_v15 = vld [vmem:[%s3529_s3 + $0x10] sm:$0xff] (!%p416_p9) }
  0x1d   : > { %v2408_v9 = vpack.c.bf16 %v491_v6, %v490_v2  ;;  %s473_s23 = scalar_select %p472_p10, %s2746_s29, 1  ;;  %2424 = vmatprep.subr.bf16.mxu1 %v2499_v8  ;;  %2493 = vrot.lane.b32.xlu1 %v2650_v17, %s2651_s17 }
  0x1e   : > { %2406 = vmatpush3.bf16.msra.mxu0 %v2405_v5  ;;  %2425 = vmatpush3.bf16.msra.mxu1 %v2499_v8  ;;  %s3646_s22 = smov (!%p2804_p11, %s2216_s22), 31 }
  0x1f   : > { %2407 = vmatprep.subr.bf16.mxu0 %v2646_v4  ;;  %s2215_s21 = sshll.u32 %s473_s23, 3  ;;  %2411 = vmatprep.subr.bf16.mxu1 %v2410_v16  ;;  %s2217_s4 = sshll.u32 %s3646_s22, 3 }
  0x20   : > { %s475_s15 = scalar_lea.vmem %s3554_s0, %s2215_s21  ;;  %s485_s5 = scalar_lea.vmem %s3528_s2, %s2215_s21  ;;  %2488 = vrot.lane.b32.xlu0 %v2650_v17, %s2651_s17 }
  0x21   : > { %v487_v18 = vld [vmem:[%s475_s15] sm:$0xff]  ;;  %s2833_s24 = scalar_lea.vmem %s3555_s1, %s2217_s4  ;;  %s3419_s21 = sand.u32 1, %s2636_s26  }
  0x22   : > { %2409 = vmatpush3.bf16.msra.mxu0 %v2408_v9  ;;  %v1149_v20 = vld [vmem:[%s485_s5] sm:$0xff]  ;;  %v578_v26 = vld [vmem:[%s2833_s24 + $0x28] sm:$0xff]  ;;  %v579_v27 = vld [vmem:[%s2833_s24 + $0x30] sm:$0xff]  ;;  %s3543_s5 = sshll.u32 %s2746_s29, 7  ;;  %s2653_s23 = smov [#allocation4]  }
  0x23   : > { %v1153_v21 = vcombine.high %v1149_v20, %v1149_v20  ;;  %2325 = vmatprep.subr.bf16.mxu0 %v2499_v8  ;;  %v1160_v22 = vrot.slane %v1149_v20, %v2820_v19  ;;  %v577_v25 = vld [vmem:[%s2833_s24 + $0x20] sm:$0xff]  ;;  %v580_v31 = vld [vmem:[%s2833_s24 + $0x38] sm:$0xff]  ;;  %v574_v33 = vld [vmem:[%s2833_s24 + $0x8] sm:$0xff]  ;;  %s3444_s16 = scalar_lea.hbm %s3539_s13, %s3543_s5 }
  0x24   : > { %v2844_v30 = vpack.c.bf16 %v578_v26, %v577_v25  ;;  %v573_v32 = vld [vmem:[%s2833_s24] sm:$0xff]  ;;  %v2850_v36 = vpack.c.bf16 %v580_v31, %v579_v27  ;;  %v575_v38 = vld [vmem:[%s2833_s24 + $0x10] sm:$0xff]  ;;  %v576_v39 = vld [vmem:[%s2833_s24 + $0x18] sm:$0xff]  ;;  %v2986_v31 = vadd.s32 8, %v2795_v12 }
  0x25   : > { %2323 = vmatmul.mubr.msk.f32.vlgmr.msra.gmra.mrb[0].mxu0 %vm3540_vm1, %v487_v18  ;;  %v1167_v24 = vrot.slane %v1153_v21, %v2820_v19  ;;  %v1176_v28 = vrot.slane %v1160_v22, %v2820_v19  ;;  %v1168_v29 = vcombine.high %v1160_v22, %v1160_v22  ;;  %v589_v37 = vpack.c.bf16 %v574_v33, %v573_v32  ;;  %v581_v40 = vld [vmem:[%s2833_s24 + $0x40] sm:$0xff]  ;;  %v582_v44 = vld [vmem:[%s2833_s24 + $0x48] sm:$0xff]  ;;  %v583_v45 = vld [vmem:[%s2833_s24 + $0x50] sm:$0xff] }
  0x26   : > { %2326 = vmatpush3.bf16.msra.mxu0 %v2499_v8  ;;  %2331 = vmatprep.mubr.msk.bf16.mxu1 %vm612_vm2, %v2844_v30  ;;  %v2861_v43 = vpack.c.bf16 %v576_v39, %v575_v38  ;;  %v584_v46 = vld [vmem:[%s2833_s24 + $0x58] sm:$0xff]  ;;  %v2873_v50 = vpack.c.bf16 %v582_v44, %v581_v40  ;;  %v585_v55 = vld [vmem:[%s2833_s24 + $0x60] sm:$0xff]  ;;  %v586_v56 = vld [vmem:[%s2833_s24 + $0x68] sm:$0xff] }
  0x27   : > { %v1183_v34 = vrot.slane %v1167_v24, %v2820_v19  ;;  %v1169_v35 = vcombine.high %v1167_v24, %v1167_v24  ;;  %v2856_v41 = vrot.slane %v1176_v28, %v2827_v23  ;;  %v1190_v42 = vrot.slane %v1168_v29, %v2820_v19  ;;  %2332 = vmatmul.mubr.msk.bf16.vlgmr.msra.gmra.mrb[0].mxu1 %vm612_vm2, %v2850_v36  ;;  %v587_v8 = vld [vmem:[%s2833_s24 + $0x70] sm:$0xff]  ;;  %v588_v9 = vld [vmem:[%s2833_s24 + $0x78] sm:$0xff]  ;;  %s3542_s24 = sshll.u32 %s3419_s21, 3 }
  0x28   : > { %v1198_v47 = vcombine.high %v1176_v28, %v1176_v28  ;;  %2327 = vmatprep.mubr.msk.bf16.mxu0 %vm612_vm2, %v589_v37  ;;  %2413 = vmatpush3.bf16.msra.mxu1 %v2410_v16  ;;  %v2891_v54 = vpack.c.bf16 %v584_v46, %v583_v45  ;;  %v2917_v63 = vpack.c.bf16 %v586_v56, %v585_v55  ;;  %v955_v16 = vld [vmem:[%s3529_s3 + $0x18] sm:$0xff]  ;;  %s471_s22 = scalar_lea.vmem [#allocation4], %s3542_s24  ;;  %s2554_s24 = sshll.u32 %s2653_s23, 4  ;;  %s2555_s24 = int_to_ptr.vmem [resolvable:$false] %s2554_s24 }
  0x29   : > { %v2867_v48 = vrot.slane %v1183_v34, %v2827_v23  ;;  %v1197_v49 = vrot.slane %v1169_v35, %v2820_v19  ;;  %vm1236_vm3 = vcmp.lt.s32.totalorder %v2795_v12, %v2856_v41  ;;  %2328 = vmatmul.mubr.msk.bf16.vlgmr.msra.gmra.mrb[4].mxu0 %vm612_vm2, %v2861_v43  ;;  %v2884_v52 = vrot.slane %v1190_v42, %v2827_v23  ;;  %s2094_s20 = sshll.u32 %s471_s22, 4  ;;  %s2556_s30 = scalar_lea.vmem %s2555_s24, 256  ;;  %s3446_s20 = int_to_ptr.vmem [resolvable:$true] %s2094_s20 }
  0x2a   : > { %v1296_v51 = vsel %vm1236_vm3, 1, %v2650_v17  ;;  %v2887_v53 = vrot.slane %v1198_v47, %v2827_v23  ;;  %2335 = vmatprep.mubr.msk.bf16.mxu1 %vm612_vm2, %v2873_v50  ;;  %v1200_v57 = vcombine.high %v1190_v42, %v1190_v42  ;;  %2345 = vmatprep.mubr.msk.bf16.mxu0 %vm612_vm2, %v589_v37  ;;  %v1199_v62 = vcombine.high %v1183_v34, %v1183_v34  ;;  %s2550_s4 = scalar_lea.vmem %s3446_s20, 128  ;;  %p2557_p1 = scmp.lt.s32.totalorder %s3446_s20, %s2555_s24 }
  0x2b   : > { %1313 = vrot.lane.b32.xlu0 %v1296_v51, %s2651_s17  ;;  %vm1238_vm4 = vcmp.lt.s32.totalorder %v2795_v12, %v2884_v52  ;;  %vm1244_vm6 = vcmp.lt.s32.totalorder %v2795_v12, %v2867_v48  ;;  %v2903_v58 = vrot.slane %v1197_v49, %v2827_v23  ;;  %v1201_v0 = vcombine.high %v1197_v49, %v1197_v49  ;;  %p2551_p12 = scmp.ne.s32.totalorder %s3446_s20, %s2550_s4  ;;  %p2558_p2 = scmp.lt.s32.totalorder %s2556_s30, %s2550_s4 }
  0x2c   : > { %vm1240_vm5 = vcmp.lt.s32.totalorder %v2795_v12, %v2887_v53  ;;  %v1298_v59 = vsel %vm1238_vm4, 1, %v2650_v17  ;;  %v2915_v61 = vrot.slane %v1200_v57, %v2827_v23  ;;  %v1304_v1 = vsel %vm1244_vm6, 1, %v2650_v17 }
  0x2d   : > { %v1300_v60 = vsel %vm1240_vm5, 1, %v2650_v17  ;;  %1317 = vrot.lane.b32.xlu1 %v1298_v59, %s2651_s17  ;;  %vm1246_vm7 = vcmp.lt.s32.totalorder %v2795_v12, %v2903_v58  ;;  %v2928_v2 = vrot.slane %v1199_v62, %v2827_v23  ;;  %v2937_v6 = vrot.slane %v1201_v0, %v2827_v23  ;;  %p2552_p13 = pnand %p2551_p12, %p2763_p5  ;;  %p2559_p3 = por %p2558_p2, %p2557_p1 }
  0x2e   : > { %vm1242_vm8 = vcmp.lt.s32.totalorder %v2795_v12, %v2915_v61  ;;  %v1306_v5 = vsel %vm1246_vm7, 1, %v2650_v17  ;;  %v2959_v13 = vpack.c.bf16 %v588_v9, %v587_v8  ;;  %v2414_v18 = vpack.c.bf16 %v955_v16, %v954_v15 }
  0x2f   : > { %1321 = vrot.lane.b32.xlu0 %v1300_v60, %s2651_s17  ;;  %2336 = vmatmul.mubr.msk.bf16.gmra.mrb[4].mxu1 %vm612_vm2, %v2891_v54  ;;  %vm1248_vm9 = vcmp.lt.s32.totalorder %v2795_v12, %v2928_v2  ;;  %v1302_v10 = vsel %vm1242_vm8, 1, %v2650_v17  ;;  %vm1250_vm10 = vcmp.lt.s32.totalorder %v2795_v12, %v2937_v6  ;;  %v2652_v34 = vmov -1e+30   ;;  %p2553_p0 = pneg %p2552_p13 }
  0x30   : > { %2339 = vmatprep.mubr.msk.bf16.mxu1 %vm612_vm2, %v2917_v63  ;;  %v1308_v11 = vsel %vm1248_vm9, 1, %v2650_v17  ;;  %v1310_v14 = vsel %vm1250_vm10, 1, %v2650_v17  ;;  %2415 = vmatprep.subr.bf16.mxu1 %v2414_v18  ;;  %v2501_v17 = vld [vmem:[%s3532_s6] sm:$0xff]  }
  0x31   : > { %1329 = vrot.lane.b32.xlu1 %v1304_v1, %s2651_s17  ;;  %2417 = vmatpush3.bf16.msra.mxu1 %v2414_v18  ;;  %p2560_p4 = pnand %p2559_p3, %p2553_p0 }
  0x32   : > { %2343 = vmatprep.subr.bf16.mxu0 %v2501_v17 }
  0x33   : > { %1333 = vrot.lane.b32.xlu0 %v1306_v5, %s2651_s17  ;;  %2344 = vmatpush3.bf16.msra.mxu0 %v2501_v17 }
  0x34   : > { %2418 = vmatprep.subr.bf16.mxu0 %v2646_v4 }
  0x35   : > { %1325 = vrot.lane.b32.xlu1 %v1302_v10, %s2651_s17 }
  0x36   : > { %2346 = vmatmul.mubr.msk.bf16.vlgmr.msra.gmra.mrb[8].mxu0 %vm612_vm2, %v2861_v43 }
  0x37   : > { %1337 = vrot.lane.b32.xlu0 %v1308_v11, %s2651_s17  ;;  %2340 = vmatmul.mubr.msk.bf16.gmra.mrb[8].mxu1 %vm612_vm2, %v2959_v13 }
  0x38   : > { %2349 = vmatprep.mubr.msk.bf16.mxu0 %vm612_vm2, %v2844_v30 }
  0x39   : > { %1341 = vrot.lane.b32.xlu1 %v1310_v14, %s2651_s17  ;;  %s2068_s17 = scalar_lea.sflag [#allocation5], %s3419_s21 }
  0x3e   : > { %2350 = vmatmul.mubr.msk.bf16.gmra.mrb[12].mxu0 %vm612_vm2, %v2850_v36 }
  0x3f   : > { %2353 = vmatprep.mubr.msk.bf16.mxu0 %vm612_vm2, %v2873_v50 }
  0x46   : > { %2354 = vmatmul.mubr.msk.bf16.gmra.mrb[16].mxu0 %vm612_vm2, %v2891_v54 }
  0x47   : > { %2357 = vmatprep.mubr.msk.bf16.mxu0 %vm612_vm2, %v2917_v63 }
  0x4e   : > { %2358 = vmatmul.mubr.msk.bf16.gmra.mrb[20].mxu0 %vm612_vm2, %v2959_v13 }
  0x8b   : > { %v2484_v20 = vpop.permute.xlu1 %2483  ;;  %v2479_v21 = vpop.permute.xlu0 %2478 }
  0x8c   : > { %v2485_v22 = vunpack.i.l.bf16 %v2484_v20  ;;  %v2481_v24 = vunpack.i.h.bf16 %v2479_v21  ;;  %v2480_v25 = vunpack.i.l.bf16 %v2479_v21  ;;  %v2486_v26 = vunpack.i.h.bf16 %v2484_v20 }
  0x8e   : > { %vm2979_vm11 = vcmp.ne.s32.totalorder %v2485_v22, 0  ;;  %vm1345_vm12 = vcmp.ne.s32.totalorder %v2481_v24, 0  ;;  %vm1343_vm13 = vcmp.ne.s32.totalorder %v2480_v25, 0  ;;  %vm2995_vm1 = vcmp.ne.s32.totalorder %v2486_v26, 0 }
  0x8f   : > { %v2983_v28 = vpop.permute.xlu1 %2493  ;;  %vm1359_vm14 = vmor %vm1236_vm3, %vm1343_vm13 }
  0x90   : > { %vm1361_vm15 = vmor %vm1238_vm4, %vm1345_vm12  ;;  %v1375_v35 = vsel %vm1359_vm14, 0.0, %v2652_v34  ;;  %vm1239_vm4 = vcmp.lt.s32.totalorder %v2986_v31, %v2884_v52  ;;  %vm1241_vm14 = vcmp.lt.s32.totalorder %v2986_v31, %v2887_v53  ;;  %v2495_v36 = vunpack.i.l.bf16 %v2983_v28 }
  0x91   : > { %v1377_v37 = vsel %vm1361_vm15, 0.0, %v2652_v34  ;;  %vm1363_vm3 = vmor %vm1240_vm5, %vm2979_vm11  ;;  %1393 = vperm.xlu0 %2497, %v1375_v35   ;;  %vm1245_vm15 = vcmp.lt.s32.totalorder %v2986_v31, %v2867_v48  ;;  %v2496_v53 = vunpack.i.h.bf16 %v2983_v28 }
  0x92   : > { %v2489_v29 = vpop.permute.xlu0 %2488  ;;  %1403 = vperm.xlu1 %2498, %v1377_v37   ;;  %v1379_v40 = vsel %vm1363_vm3, 0.0, %v2652_v34  ;;  %vm1365_vm13 = vmor %vm1242_vm8, %vm2995_vm1 }
  0x93   : > { %v2490_v33 = vunpack.i.l.bf16 %v2489_v29  ;;  %v2491_v42 = vunpack.i.h.bf16 %v2489_v29  ;;  %v1381_v45 = vsel %vm1365_vm13, 0.0, %v2652_v34  ;;  %vm1243_vm13 = vcmp.lt.s32.totalorder %v2986_v31, %v2915_v61  ;;  %v2219_v61 = vld [vmem:[%s3534_s8] ss:$0 sm:$0xff] }
  0x95   : > { %vm1351_vm5 = vcmp.ne.s32.totalorder %v2490_v33, 0  ;;  %vm1353_vm8 = vcmp.ne.s32.totalorder %v2491_v42, 0 }
  0x96   : > { %1413 = vperm.xlu1 %2498, %v1379_v40   ;;  %vm1367_vm1 = vmor %vm1244_vm6, %vm1351_vm5 }
  0x97   : > { %v1383_v49 = vsel %vm1367_vm1, 0.0, %v2652_v34  ;;  %vm1369_vm5 = vmor %vm1246_vm7, %vm1353_vm8  ;;  %vm1355_vm7 = vcmp.ne.s32.totalorder %v2495_v36, 0 }
  0x98   : > { %v1385_v51 = vsel %vm1369_vm5, 0.0, %v2652_v34 }
  0x9a   : > { %1423 = vperm.xlu1 %2498, %v1381_v45  }
  0x9d   : > { %v1314_v38 = vpop.permute.xlu0 %1313 }
  0x9e   : > { %1433 = vperm.xlu1 %2498, %v1383_v49  }
  0x9f   : > { %v1318_v39 = vpop.permute.xlu1 %1317 }
  0xa0   : > { %vm1346_vm12 = vcmp.ne.s32.totalorder %v1318_v39, 0 }
  0xa1   : > { %vm1362_vm11 = vmor %vm1239_vm4, %vm1346_vm12  ;;  %v1322_v43 = vpop.permute.xlu0 %1321 }
  0xa2   : > { %v1378_v44 = vsel %vm1362_vm11, 0.0, %v2652_v34  ;;  %vm1348_vm3 = vcmp.ne.s32.totalorder %v1322_v43, 0  ;;  %vm1344_vm11 = vcmp.ne.s32.totalorder %v1314_v38, 0  ;;  %1443 = vperm.xlu1 %2498, %v1385_v51  }
  0xa3   : > { %v1330_v30 = vpop.permute.xlu1 %1329  ;;  %1408 = vperm.xlu0 %2497, %v1378_v44   ;;  %vm1364_vm4 = vmor %vm1241_vm14, %vm1348_vm3 }
  0xa4   : > { %vm1352_vm0 = vcmp.ne.s32.totalorder %v1330_v30, 0  ;;  %v1380_v46 = vsel %vm1364_vm4, 0.0, %v2652_v34  ;;  %vm1249_vm4 = vcmp.lt.s32.totalorder %v2986_v31, %v2928_v2 }
  0xa5   : > { %vm1368_vm12 = vmor %vm1245_vm15, %vm1352_vm0  ;;  %v1334_v48 = vpop.permute.xlu0 %1333  ;;  %vm1237_vm0 = vcmp.lt.s32.totalorder %v2986_v31, %v2856_v41  ;;  %vm1247_vm15 = vcmp.lt.s32.totalorder %v2986_v31, %v2903_v58 }
  0xa6   : > { %v1384_v50 = vsel %vm1368_vm12, 0.0, %v2652_v34  ;;  %vm1354_vm3 = vcmp.ne.s32.totalorder %v1334_v48, 0  ;;  %vm1360_vm1 = vmor %vm1237_vm0, %vm1344_vm11  ;;  %vm1251_vm0 = vcmp.lt.s32.totalorder %v2986_v31, %v2937_v6 }
  0xa7   : > { %v1326_v47 = vpop.permute.xlu1 %1325  ;;  %1418 = vperm.xlu0 %2497, %v1380_v46   ;;  %vm1370_vm8 = vmor %vm1247_vm15, %vm1354_vm3  ;;  %v1376_v55 = vsel %vm1360_vm1, 0.0, %v2652_v34  ;;  %vm3560_vm15 = vmmov 0  }
  0xa8   : > { %vm1350_vm6 = vcmp.ne.s32.totalorder %v1326_v47, 0  ;;  %v1386_v54 = vsel %vm1370_vm8, 0.0, %v2652_v34  ;;  %1398 = vperm.xlu1 %2498, %v1376_v55   ;;  %2401 = vmatprep.mubr.msk.f32.mxu0 %vm3560_vm15, %v2648_v7  ;;  %v3078_v7 = vld [vmem:[%s3535_s9] ss:$0 sm:$0xff] }
  0xa9   : > { %vm1366_vm14 = vmor %vm1243_vm13, %vm1350_vm6  ;;  %v1338_v52 = vpop.permute.xlu0 %1337  ;;  %vm1357_vm6 = vcmp.ne.s32.totalorder %v2496_v53, 0 }
  0xaa   : > { %v1382_v41 = vsel %vm1366_vm14, 0.0, %v2652_v34  ;;  %vm1356_vm12 = vcmp.ne.s32.totalorder %v1338_v52, 0  ;;  %vm1371_vm13 = vmor %vm1248_vm9, %vm1355_vm7 }
  0xab   : > { %1438 = vperm.xlu0 %2497, %v1384_v50   ;;  %v1342_v56 = vpop.permute.xlu1 %1341  ;;  %vm1372_vm5 = vmor %vm1249_vm4, %vm1356_vm12  ;;  %v1387_v57 = vsel %vm1371_vm13, 0.0, %v2652_v34 }
  0xac   : > { %vm1358_vm11 = vcmp.ne.s32.totalorder %v1342_v56, 0  ;;  %vm1373_vm14 = vmor %vm1250_vm10, %vm1357_vm6  ;;  %v1388_v58 = vsel %vm1372_vm5, 0.0, %v2652_v34  ;;  %1453 = vperm.xlu1 %2498, %v1387_v57   ;;  %vm3561_vm10 = vcmask 261120  }
  0xad   : > { %vm1374_vm9 = vmor %vm1251_vm0, %vm1358_vm11  ;;  %v1389_v59 = vsel %vm1373_vm14, 0.0, %v2652_v34 }
  0xae   : > { %v1390_v60 = vsel %vm1374_vm9, 0.0, %v2652_v34  ;;  %vm3562_vm3 = vmmov %vm3561_vm10 }
  0xaf   : > { %1428 = vperm.xlu0 %2497, %v1382_v41   ;;  %vm3563_vm1 = vmmov %vm3562_vm3 }
  0xb0   : > { %1463 = vperm.xlu1 %2498, %v1389_v59   ;;  %vm3564_vm7 = vmmov %vm3563_vm1 }
  0xb1   : > { %vm3565_vm8 = vmmov %vm3563_vm1 }
  0xb2   : > { %vm3566_vm4 = vmmov %vm3563_vm1 }
  0xb3   : > { %1448 = vperm.xlu0 %2497, %v1386_v54   ;;  %vm3567_vm12 = vmmov %vm3563_vm1 }
  0xb4   : > { %vm3568_vm13 = vmmov %vm3563_vm1 }
  0xb5   : > { %vm3569_vm6 = vmmov %vm3563_vm1 }
  0xb6   : > { %vm3570_vm5 = vmmov %vm3563_vm1 }
  0xb7   : > { %1458 = vperm.xlu0 %2497, %v1388_v58   ;;  %vm3571_vm0 = vmmov %vm3563_vm1 }
  0xb8   : > { %vm3572_vm11 = vmmov %vm3571_vm0 }
  0xb9   : > { %vm3573_vm14 = vmmov %vm3571_vm0 }
  0xba   : > { %vm3574_vm9 = vmmov %vm3571_vm0 }
  0xbb   : > { %1468 = vperm.xlu0 %2497, %v1390_v60   ;;  %vm3575_vm15 = vmmov %vm3571_vm0 }
  0xf8   : > { %v569_v62 = vpop.f32.mrb[0].mxu0 }
  0xf9   : > { %v570_v63 = vadd.f32 %v2219_v61, %v569_v62  ;;  %v2324_v0 = vpop.f32.mrb[1].mxu0 }
  0xfa   : > { %v2333_v9 = vpop.f32.mrb[0].mxu1 }
  0xfb   : > { %v847_v1 = vcombine.high %v570_v63, %v570_v63  ;;  %v854_v2 = vrot.slane %v570_v63, %v2820_v19  ;;  %v696_v11 = vadd.f32 %v2333_v9, %v3078_v7  ;;  %v687_v13 = vpop.f32.mrb[1].mxu1 }
  0xfc   : > { %v2329_v10 = vpop.f32.mrb[4].mxu0  ;;  %v2334_v21 = vpop.f32.mrb[2].mxu1  ;;  %v688_v24 = vadd.f32 %v3078_v7, %v687_v13 }
  0xfd   : > { %v861_v5 = vrot.slane %v847_v1, %v2820_v19  ;;  %v862_v6 = vcombine.high %v854_v2, %v854_v2  ;;  %v870_v8 = vrot.slane %v854_v2, %v2820_v19  ;;  %v680_v15 = vadd.f32 %v2329_v10, %v3078_v7  ;;  %v671_v18 = vpop.f32.mrb[5].mxu0  ;;  %v690_v27 = vpop.f32.mrb[3].mxu1 }
  0xfe   : > { %v672_v17 = vadd.f32 %v3078_v7, %v671_v18  ;;  %v2330_v22 = vpop.f32.mrb[6].mxu0  ;;  %v699_v26 = vadd.f32 %v2334_v21, %v3078_v7  ;;  %v691_v33 = vadd.f32 %v3078_v7, %v690_v27 }
  0xff   : > { %v863_v14 = vcombine.high %v861_v5, %v861_v5  ;;  %v884_v16 = vrot.slane %v862_v6, %v2820_v19  ;;  %v899_v20 = vrot.slane %v870_v8, %v2827_v23  ;;  %v892_v25 = vcombine.high %v870_v8, %v870_v8  ;;  %v674_v32 = vpop.f32.mrb[7].mxu0 }
 0x100   : > { %v683_v31 = vadd.f32 %v2330_v22, %v3078_v7  ;;  %v675_v37 = vadd.f32 %v3078_v7, %v674_v32  ;;  %v877_v43 = vrot.slane %v861_v5, %v2820_v19 }
 0x101   : > { %v903_v28 = vrot.slane %v884_v16, %v2827_v23  ;;  %v894_v29 = vcombine.high %v884_v16, %v884_v16  ;;  %v936_v34 = vmul.f32 %v899_v20, %v672_v17  ;;  %v907_v35 = vrot.slane %v892_v25, %v2827_v23 }
 0x102   : > { %v891_v38 = vrot.slane %v863_v14, %v2820_v19  ;;  %v937_v30 = vmul.f32 %v899_v20, %v675_v37  ;;  %v2337_v48 = vpop.f32.mrb[4].mxu1  ;;  %v915_v52 = vrot.slane %v877_v43, %v2827_v23  ;;  %v893_v60 = vcombine.high %v877_v43, %v877_v43 }
 0x103   : > { %v938_v39 = vmul.f32 %v903_v28, %v680_v15  ;;  %v911_v40 = vrot.slane %v894_v29, %v2827_v23  ;;  %v939_v42 = vmul.f32 %v903_v28, %v683_v31  ;;  %v940_v44 = vmul.f32 %v907_v35, %v688_v24  ;;  %2369 = vmatprep.mubr.msk.f32.mxu1 %vm3561_vm10, %v936_v34  ;;  %v703_v50 = vpop.f32.mrb[5].mxu1  ;;  %vm3576_vm10 = vmmov %vm3571_vm0  ;;  %v1791_v34 = vld [vmem:[%s3533_s7] sm:$0xff] }
 0x104   : > { %v941_v45 = vmul.f32 %v907_v35, %v691_v33  ;;  %v919_v46 = vrot.slane %v891_v38, %v2827_v23  ;;  %v712_v36 = vadd.f32 %v2337_v48, %v3078_v7  ;;  %2370 = vmatmul.mubr.msk.f32.vlgmr.msra.gmra.mrb[12].mxu1 %vm3562_vm3, %v937_v30  ;;  %v704_v51 = vadd.f32 %v3078_v7, %v703_v50  ;;  %v2338_v19 = vpop.f32.mrb[6].mxu1  ;;  %v1792_v35 = vld [vmem:[%s3533_s7 + $0x8] sm:$0xff]  ;;  %vm3577_vm3 = vmmov %vm3571_vm0 }
 0x105   : > { %v942_v47 = vmul.f32 %v911_v40, %v696_v11  ;;  %v943_v49 = vmul.f32 %v911_v40, %v699_v26  ;;  %2372 = vmatprep.mubr.msk.f32.mxu1 %vm3563_vm1, %v938_v39  ;;  %v715_v41 = vadd.f32 %v2338_v19, %v3078_v7  ;;  %v706_v55 = vpop.f32.mrb[7].mxu1  ;;  %v895_v58 = vcombine.high %v891_v38, %v891_v38  ;;  %v1793_v40 = vld [vmem:[%s3533_s7 + $0x10] sm:$0xff]  ;;  %vm3578_vm1 = vmmov %vm3571_vm0 }
 0x106   : > { %v946_v53 = vmul.f32 %v919_v46, %v712_v36  ;;  %v944_v56 = vmul.f32 %v915_v52, %v704_v51  ;;  %v707_v54 = vadd.f32 %v3078_v7, %v706_v55  ;;  %v923_v2 = vrot.slane %v893_v60, %v2827_v23 }
 0x107   : > { %v947_v57 = vmul.f32 %v919_v46, %v715_v41  ;;  %v927_v63 = vrot.slane %v895_v58, %v2827_v23  ;;  %v2419_v37 = vpack.c.bf16 %v1792_v35, %v1791_v34 }
 0x108   : > { %2373 = vmatmul.mubr.msk.f32.gmra.mrb[14].mxu1 %vm3564_vm7, %v939_v42  ;;  %v945_v59 = vmul.f32 %v915_v52, %v707_v54  ;;  %v1794_v42 = vld [vmem:[%s3533_s7 + $0x18] sm:$0xff]  ;;  %vm3579_vm7 = vmmov %vm3571_vm0 }
 0x109   : > { %2375 = vmatprep.mubr.msk.f32.mxu1 %vm3565_vm8, %v940_v44  ;;  %v3125_v23 = vpop.f32.mrb[8].mxu0  ;;  %2420 = vmatpush3.bf16.msra.mxu0 %v2419_v37  ;;  %v2422_v44 = vpack.c.bf16 %v1794_v42, %v1793_v40  ;;  %vm3580_vm8 = vmmov %vm3571_vm0 }
 0x10a   : > { %v2341_v61 = vpop.f32.mrb[8].mxu1  ;;  %2421 = vmatprep.subr.bf16.mxu0 %v2646_v4 }
 0x10b   : > { %v728_v62 = vadd.f32 %v2341_v61, %v3078_v7  ;;  %v719_v0 = vpop.f32.mrb[9].mxu1 }
 0x10c   : > { %2376 = vmatmul.mubr.msk.f32.gmra.mrb[16].mxu1 %vm3566_vm4, %v941_v45  ;;  %v720_v1 = vadd.f32 %v3078_v7, %v719_v0  ;;  %v2342_v5 = vpop.f32.mrb[10].mxu1  ;;  %vm3581_vm4 = vmmov %vm3571_vm0 }
 0x10d   : > { %2378 = vmatprep.mubr.msk.f32.mxu1 %vm3567_vm12, %v942_v47  ;;  %v950_v6 = vmul.f32 %v927_v63, %v728_v62  ;;  %v731_v8 = vadd.f32 %v2342_v5, %v3078_v7  ;;  %v722_v9 = vpop.f32.mrb[11].mxu1  ;;  %2423 = vmatpush3.bf16.msra.mxu0 %v2422_v44  ;;  %vm3582_vm12 = vmmov %vm3571_vm0 }
 0x10e   : > { %v948_v10 = vmul.f32 %v923_v2, %v720_v1  ;;  %v723_v11 = vadd.f32 %v3078_v7, %v722_v9  ;;  %v3127_v7 = vpop.f32.mrb[9].mxu0 }
 0x10f   : > { %v951_v13 = vmul.f32 %v927_v63, %v731_v8  ;;  %v3129_v15 = vpop.f32.mrb[10].mxu0 }
 0x110   : > { %2379 = vmatmul.mubr.msk.f32.gmra.mrb[18].mxu1 %vm3568_vm13, %v943_v49  ;;  %v949_v14 = vmul.f32 %v923_v2, %v723_v11  ;;  %v3131_v16 = vpop.f32.mrb[11].mxu0  ;;  %v1394_v39 = vpop.permute.xlu0 %1393  ;;  %vm3583_vm13 = vmmov %vm3571_vm0 }
 0x111   : > { %2381 = vmatprep.mubr.msk.f32.mxu1 %vm3569_vm6, %v944_v56  ;;  %v3133_v18 = vpop.f32.mrb[12].mxu0  ;;  %v1404_v32 = vpop.permute.xlu1 %1403  ;;  %vm3584_vm6 = vmmov %vm3571_vm0 }
 0x112   : > { %v3135_v20 = vpop.f32.mrb[13].mxu0 }
 0x113   : > { %v3137_v21 = vpop.f32.mrb[14].mxu0 }
 0x114   : > { %2382 = vmatmul.mubr.msk.f32.gmra.mrb[20].mxu1 %vm3570_vm5, %v945_v59  ;;  %v3139_v17 = vpop.f32.mrb[15].mxu0  ;;  %vm3585_vm5 = vmmov %vm3571_vm0 }
 0x115   : > { %2384 = vmatprep.mubr.msk.f32.mxu1 %vm3571_vm0, %v946_v53  ;;  %v1414_v33 = vpop.permute.xlu1 %1413 }
 0x118   : > { %2385 = vmatmul.mubr.msk.f32.gmra.mrb[22].mxu1 %vm3572_vm11, %v947_v57  ;;  %vm3586_vm11 = vmmov %vm3571_vm0 }
 0x119   : > { %2387 = vmatprep.mubr.msk.f32.mxu1 %vm3573_vm14, %v948_v10  ;;  %v3141_v22 = vpop.f32.mrb[16].mxu0  ;;  %v1424_v38 = vpop.permute.xlu1 %1423  ;;  %vm3587_vm14 = vmmov %vm3571_vm0 }
 0x11a   : > { %v3143_v24 = vpop.f32.mrb[17].mxu0 }
 0x11b   : > { %v3145_v25 = vpop.f32.mrb[18].mxu0 }
 0x11c   : > { %2388 = vmatmul.mubr.msk.f32.gmra.mrb[24].mxu1 %vm3574_vm9, %v949_v14  ;;  %v3147_v26 = vpop.f32.mrb[19].mxu0  ;;  %vm3588_vm9 = vmmov %vm3571_vm0 }
 0x11d   : > { %2390 = vmatprep.mubr.msk.f32.mxu1 %vm3575_vm15, %v950_v6  ;;  %v1434_v43 = vpop.permute.xlu1 %1433  ;;  %vm3589_vm15 = vmmov %vm3571_vm0 }
 0x120   : > { %2391 = vmatmul.mubr.msk.f32.gmra.mrb[26].mxu1 %vm3576_vm10, %v951_v13  ;;  %vm3590_vm10 = vmmov %vm3571_vm0 }
 0x121   : > { %v3149_v27 = vpop.f32.mrb[20].mxu0  ;;  %v3170_v45 = vpop.permute.xlu1 %1443 }
 0x122   : > { %v3151_v28 = vpop.f32.mrb[21].mxu0  ;;  %v1409_v30 = vpop.permute.xlu0 %1408 }
 0x123   : > { %v3153_v29 = vpop.f32.mrb[22].mxu0 }
 0x124   : > { %v3155_v31 = vpop.f32.mrb[23].mxu0 }
 0x126   : > { %v1419_v46 = vpop.permute.xlu0 %1418 }
 0x127   : > { %v1399_v47 = vpop.permute.xlu1 %1398 }
 0x12a   : > { %v1439_v19 = vpop.permute.xlu0 %1438 }
 0x12e   : > { %v1429_v1 = vpop.permute.xlu0 %1428 }
 0x132   : > { %v1449_v44 = vpop.permute.xlu0 %1448 }
 0x1d7   : > { %v2371_v49 = vpop.f32.mrb[12].mxu1 }
 0x1d8   : > { %v1472_v4 = vadd.f32 %v2371_v49, %v1399_v47  ;;  %v1070_v48 = vpop.f32.mrb[13].mxu1 }
 0x1d9   : > { %v1471_v36 = vadd.f32 %v1394_v39, %v1070_v48 }
 0x1da   : > { %v1488_v50 = vsel %vm3577_vm3, %v1472_v4, -inf  ;;  %vm3591_vm3 = vmmov %vm3571_vm0 }
 0x1db   : > { %v1487_v51 = vsel %vm3578_vm1, %v1471_v36, -inf  ;;  %v2374_v52 = vpop.f32.mrb[14].mxu1  ;;  %vm3592_vm1 = vmmov %vm3571_vm0 }
 0x1dc   : > { %v1489_v53 = vmax.f32 %v1487_v51, %v1488_v50  ;;  %v3174_v41 = vadd.f32 %v2374_v52, %v1409_v30  ;;  %v1080_v55 = vpop.f32.mrb[15].mxu1 }
 0x1dd   : > { %v3176_v56 = vadd.f32 %v1404_v32, %v1080_v55 }
 0x1de   : > { %v1490_v54 = vrot.slane %v1489_v53, 4  ;;  %v1497_v57 = vsel %vm3579_vm7, %v3174_v41, -inf  ;;  %vm3593_vm7 = vmmov %vm3571_vm0 }
 0x1df   : > { %v1496_v58 = vsel %vm3580_vm8, %v3176_v56, -inf  ;;  %v2377_v59 = vpop.f32.mrb[16].mxu1  ;;  %vm3594_vm8 = vmmov %vm3571_vm0 }
 0x1e0   : > { %v1491_v60 = vmax.f32 %v1489_v53, %v1490_v54  ;;  %v1498_v61 = vmax.f32 %v1496_v58, %v1497_v57  ;;  %v3182_v62 = vadd.f32 %v2377_v59, %v1419_v46  ;;  %v1090_v63 = vpop.f32.mrb[17].mxu1 }
 0x1e1   : > { %v3184_v0 = vadd.f32 %v1414_v33, %v1090_v63 }
 0x1e2   : > { %v1492_v2 = vrot.slane %v1491_v60, 2  ;;  %v1499_v5 = vrot.slane %v1498_v61, 4  ;;  %v1506_v6 = vsel %vm3581_vm4, %v3182_v62, -inf  ;;  %vm3595_vm4 = vmmov %vm3571_vm0 }
 0x1e3   : > { %v1505_v8 = vsel %vm3582_vm12, %v3184_v0, -inf  ;;  %v2380_v9 = vpop.f32.mrb[18].mxu1  ;;  %vm3596_vm12 = vmmov %vm3571_vm0 }
 0x1e4   : > { %v1493_v10 = vmax.f32 %v1491_v60, %v1492_v2  ;;  %v1500_v11 = vmax.f32 %v1498_v61, %v1499_v5  ;;  %v1507_v13 = vmax.f32 %v1505_v8, %v1506_v6  ;;  %v3190_v14 = vadd.f32 %v2380_v9, %v1429_v1  ;;  %v1100_v32 = vpop.f32.mrb[19].mxu1 }
 0x1e5   : > { %v3192_v34 = vadd.f32 %v1424_v38, %v1100_v32 }
 0x1e6   : > { %v1494_v33 = vrot.slane %v1493_v10, 1  ;;  %v1501_v35 = vrot.slane %v1500_v11, 2  ;;  %v1508_v37 = vrot.slane %v1507_v13, 4  ;;  %v1515_v39 = vsel %vm3583_vm13, %v3190_v14, -inf  ;;  %vm3597_vm13 = vmmov %vm3571_vm0 }
 0x1e7   : > { %v1514_v40 = vsel %vm3584_vm6, %v3192_v34, -inf  ;;  %v2383_v42 = vpop.f32.mrb[20].mxu1  ;;  %vm3598_vm6 = vmmov %vm3571_vm0 }
 0x1e8   : > { %v1495_v30 = vmax.f32 %v1493_v10, %v1494_v33  ;;  %v1502_v46 = vmax.f32 %v1500_v11, %v1501_v35  ;;  %v1509_v47 = vmax.f32 %v1507_v13, %v1508_v37  ;;  %v1516_v49 = vmax.f32 %v1514_v40, %v1515_v39  ;;  %v1110_v48 = vpop.f32.mrb[21].mxu1  ;;  %v1454_v10 = vpop.permute.xlu1 %1453 }
 0x1e9   : > { %v3198_v50 = vadd.f32 %v2383_v42, %v1439_v19  ;;  %v3200_v38 = vadd.f32 %v1434_v43, %v1110_v48 }
 0x1ea   : > { %v1559_v51 = vsub.f32 %v1471_v36, %v1495_v30  ;;  %v1560_v52 = vsub.f32 %v1472_v4, %v1495_v30  ;;  %v1503_v53 = vrot.slane %v1502_v46, 1  ;;  %v1510_v55 = vrot.slane %v1509_v47, 2  ;;  %v1459_v36 = vpop.permute.xlu0 %1458 }
 0x1eb   : > { %v1517_v54 = vrot.slane %v1516_v49, 4  ;;  %v1524_v57 = vsel %vm3585_vm5, %v3198_v50, -inf  ;;  %v1523_v58 = vsel %vm3571_vm0, %v3200_v38, -inf  ;;  %v2386_v59 = vpop.f32.mrb[22].mxu1  ;;  %vm3599_vm5 = vmmov %vm3571_vm0 }
 0x1ec   : > { %v1575_v60 = vmul.f32 1.442695, %v1559_v51  ;;  %v1577_v61 = vmul.f32 1.442695, %v1560_v52  ;;  %v1504_v63 = vmax.f32 %v1502_v46, %v1503_v53  ;;  %v1511_v1 = vmax.f32 %v1509_v47, %v1510_v55  ;;  %v1120_v19 = vpop.f32.mrb[23].mxu1 }
 0x1ed   : > { %v1518_v2 = vmax.f32 %v1516_v49, %v1517_v54  ;;  %v1525_v43 = vmax.f32 %v1523_v58, %v1524_v57  ;;  %v3206_v5 = vadd.f32 %v2386_v59, %v1449_v44  ;;  %v3209_v4 = vadd.f32 %v3170_v45, %v1120_v19  ;;  %v1464_v59 = vpop.permute.xlu1 %1463 }
 0x1ee   : > { %2502 = vpow2.f32 %v1575_v60  ;;  %v1561_v6 = vsub.f32 %v3176_v56, %v1504_v63  ;;  %v1562_v8 = vsub.f32 %v3174_v41, %v1504_v63  ;;  %v1512_v9 = vrot.slane %v1511_v1, 1  ;;  %v1469_v53 = vpop.permute.xlu0 %1468 }
 0x1ef   : > { %2504 = vpow2.f32 %v1577_v61  ;;  %v1519_v11 = vrot.slane %v1518_v2, 2  ;;  %v1526_v13 = vrot.slane %v1525_v43, 4  ;;  %v1533_v32 = vsel %vm3586_vm11, %v3206_v5, -inf  ;;  %v2389_v33 = vpop.f32.mrb[24].mxu1  ;;  %vm3600_vm11 = vmmov %vm3571_vm0 }
 0x1f0   : > { %v1579_v35 = vmul.f32 1.442695, %v1561_v6  ;;  %v1581_v37 = vmul.f32 1.442695, %v1562_v8  ;;  %v1513_v39 = vmax.f32 %v1511_v1, %v1512_v9  ;;  %v1532_v45 = vsel %vm3587_vm14, %v3209_v4, -inf  ;;  %v1130_v40 = vpop.f32.mrb[25].mxu1  ;;  %vm3601_vm14 = vmmov %vm3571_vm0 }
 0x1f1   : > { %v1520_v42 = vmax.f32 %v1518_v2, %v1519_v11  ;;  %v1527_v56 = vmax.f32 %v1525_v43, %v1526_v13  ;;  %v1534_v44 = vmax.f32 %v1532_v45, %v1533_v32  ;;  %v3217_v41 = vadd.f32 %v2389_v33, %v1459_v36 }
 0x1f2   : > { %2506 = vpow2.f32 %v1579_v35  ;;  %v1563_v30 = vsub.f32 %v3184_v0, %v1513_v39  ;;  %v1564_v46 = vsub.f32 %v3182_v62, %v1513_v39  ;;  %v3221_v47 = vadd.f32 %v1454_v10, %v1130_v40 }
 0x1f3   : > { %2508 = vpow2.f32 %v1581_v37  ;;  %v1521_v49 = vrot.slane %v1520_v42, 1  ;;  %v1528_v48 = vrot.slane %v1527_v56, 2  ;;  %v1535_v51 = vrot.slane %v1534_v44, 4  ;;  %v2392_v52 = vpop.f32.mrb[26].mxu1 }
 0x1f4   : > { %v1583_v55 = vmul.f32 1.442695, %v1563_v30  ;;  %v1585_v54 = vmul.f32 1.442695, %v1564_v46  ;;  %v1542_v57 = vsel %vm3588_vm9, %v3217_v41, -inf  ;;  %v1541_v58 = vsel %vm3589_vm15, %v3221_v47, -inf  ;;  %vm3602_vm9 = vmmov %vm3571_vm0 }
 0x1f5   : > { %v1522_v0 = vmax.f32 %v1520_v42, %v1521_v49  ;;  %v1529_v60 = vmax.f32 %v1527_v56, %v1528_v48  ;;  %v1536_v62 = vmax.f32 %v1534_v44, %v1535_v51  ;;  %v1543_v61 = vmax.f32 %v1541_v58, %v1542_v57  ;;  %v1140_v63 = vpop.f32.mrb[27].mxu1  ;;  %vm3603_vm15 = vmmov %vm3571_vm0 }
 0x1f6   : > { %2510 = vpow2.f32 %v1583_v55  ;;  %v3227_v1 = vadd.f32 %v2392_v52, %v1469_v53  ;;  %v3229_v19 = vadd.f32 %v1464_v59, %v1140_v63 }
 0x1f7   : > { %2512 = vpow2.f32 %v1585_v54  ;;  %v1565_v2 = vsub.f32 %v3192_v34, %v1522_v0  ;;  %v1566_v43 = vsub.f32 %v3190_v14, %v1522_v0  ;;  %v1530_v36 = vrot.slane %v1529_v60, 1 }
 0x1f8   : > { %v3233_v6 = vpop.eup %2502  ;;  %v1537_v8 = vrot.slane %v1536_v62, 2  ;;  %v1544_v9 = vrot.slane %v1543_v61, 4  ;;  %v1551_v10 = vsel %vm3590_vm10, %v3227_v1, -inf  ;;  %v1550_v11 = vsel %vm3591_vm3, %v3229_v19, -inf  ;;  %vm3604_vm10 = vmmov %vm3571_vm0 }
 0x1f9   : > { %v3239_v13 = vpop.eup %2504  ;;  %v1607_v32 = vsel %vm3592_vm1, %v3233_v6, 0.0  ;;  %v1587_v33 = vmul.f32 1.442695, %v1565_v2  ;;  %v1589_v34 = vmul.f32 1.442695, %v1566_v43  ;;  %v1531_v35 = vmax.f32 %v1529_v60, %v1530_v36  ;;  %vm3605_vm3 = vmmov %vm3571_vm0 }
 0x1fa   : > { %v1608_v14 = vsel %vm3593_vm7, %v3239_v13, 0.0  ;;  %v1538_v37 = vmax.f32 %v1536_v62, %v1537_v8  ;;  %v1545_v39 = vmax.f32 %v1543_v61, %v1544_v9  ;;  %v1552_v45 = vmax.f32 %v1550_v11, %v1551_v10  ;;  %vm3606_vm1 = vmmov %vm3571_vm0 }
 0x1fb   : > { %v1609_v40 = vadd.f32 %v1608_v14, %v1607_v32  ;;  %2514 = vpow2.f32 %v1587_v33  ;;  %v1567_v42 = vsub.f32 %v3200_v38, %v1531_v35  ;;  %v1568_v56 = vsub.f32 %v3198_v50, %v1531_v35  ;;  %vm3607_vm7 = vmmov %vm3571_vm0 }
 0x1fc   : > { %v3247_v44 = vpop.eup %2506  ;;  %2516 = vpow2.f32 %v1589_v34  ;;  %v1539_v30 = vrot.slane %v1538_v37, 1  ;;  %v1546_v46 = vrot.slane %v1545_v39, 2  ;;  %v1553_v49 = vrot.slane %v1552_v45, 4 }
 0x1fd   : > { %v3249_v48 = vpop.eup %2508  ;;  %v1610_v51 = vrot.slane %v1609_v40, 4  ;;  %v1616_v52 = vsel %vm3594_vm8, %v3247_v44, 0.0  ;;  %v1591_v53 = vmul.f32 1.442695, %v1567_v42  ;;  %v1593_v55 = vmul.f32 1.442695, %v1568_v56  ;;  %vm3608_vm8 = vmmov %vm3571_vm0 }
 0x1fe   : > { %v1617_v54 = vsel %vm3595_vm4, %v3249_v48, 0.0  ;;  %v1540_v38 = vmax.f32 %v1538_v37, %v1539_v30  ;;  %v1547_v57 = vmax.f32 %v1545_v39, %v1546_v46  ;;  %v1554_v50 = vmax.f32 %v1552_v45, %v1553_v49  ;;  %vm3609_vm4 = vmmov %vm3571_vm0 }
 0x1ff   : > { %v1611_v58 = vadd.f32 %v1610_v51, %v1609_v40  ;;  %v1618_v59 = vadd.f32 %v1617_v54, %v1616_v52  ;;  %2518 = vpow2.f32 %v1591_v53 }
 0x200   : > { %v3255_v0 = vpop.eup %2510  ;;  %2520 = vpow2.f32 %v1593_v55  ;;  %v1569_v60 = vsub.f32 %v3209_v4, %v1540_v38  ;;  %v1570_v62 = vsub.f32 %v3206_v5, %v1540_v38  ;;  %v1548_v61 = vrot.slane %v1547_v57, 1 }
 0x201   : > { %v3259_v63 = vpop.eup %2512  ;;  %v1612_v2 = vrot.slane %v1611_v58, 2  ;;  %v1619_v43 = vrot.slane %v1618_v59, 4  ;;  %v1625_v36 = vsel %vm3596_vm12, %v3255_v0, 0.0  ;;  %v1555_v8 = vrot.slane %v1554_v50, 2  ;;  %vm3610_vm12 = vmmov %vm3571_vm0 }
 0x202   : > { %v1626_v9 = vsel %vm3597_vm13, %v3259_v63, 0.0  ;;  %v1595_v10 = vmul.f32 1.442695, %v1569_v60  ;;  %v1597_v11 = vmul.f32 1.442695, %v1570_v62  ;;  %v1549_v32 = vmax.f32 %v1547_v57, %v1548_v61  ;;  %vm3611_vm13 = vmmov %vm3571_vm0 }
 0x203   : > { %v1620_v33 = vadd.f32 %v1619_v43, %v1618_v59  ;;  %v1627_v34 = vadd.f32 %v1626_v9, %v1625_v36  ;;  %v1556_v4 = vmax.f32 %v1554_v50, %v1555_v8  ;;  %v1613_v35 = vadd.f32 %v1612_v2, %v1611_v58 }
 0x204   : > { %2522 = vpow2.f32 %v1595_v10  ;;  %v1571_v5 = vsub.f32 %v3221_v47, %v1549_v32  ;;  %v1572_v14 = vsub.f32 %v3217_v41, %v1549_v32 }
 0x205   : > { %v3267_v37 = vpop.eup %2514  ;;  %v1621_v39 = vrot.slane %v1620_v33, 2  ;;  %v1628_v45 = vrot.slane %v1627_v34, 4  ;;  %2524 = vpow2.f32 %v1597_v11  ;;  %v1557_v40 = vrot.slane %v1556_v4, 1 }
 0x206   : > { %v3269_v42 = vpop.eup %2516  ;;  %v1634_v56 = vsel %vm3598_vm6, %v3267_v37, 0.0  ;;  %v1599_v30 = vmul.f32 1.442695, %v1571_v5  ;;  %v1601_v46 = vmul.f32 1.442695, %v1572_v14  ;;  %v1614_v49 = vrot.slane %v1613_v35, 1  ;;  %vm3612_vm6 = vmmov %vm3571_vm0 }
 0x207   : > { %v1629_v51 = vadd.f32 %v1628_v45, %v1627_v34  ;;  %v1635_v47 = vsel %vm3599_vm5, %v3269_v42, 0.0  ;;  %v1558_v52 = vmax.f32 %v1556_v4, %v1557_v40  ;;  %v1622_v41 = vadd.f32 %v1621_v39, %v1620_v33  ;;  %v3290_v33 = vld [vmem:[%s3536_s10] ss:$0 sm:$0xff]  ;;  %vm3613_vm5 = vmmov %vm3571_vm0 }
 0x208   : > { %v1636_v53 = vadd.f32 %v1635_v47, %v1634_v56  ;;  %2526 = vpow2.f32 %v1599_v30  ;;  %v1615_v55 = vadd.f32 %v1614_v49, %v1613_v35  ;;  %v792_v40 = vadd.f32 %v3125_v23, %v3290_v33 }
 0x209   : > { %v3275_v54 = vpop.eup %2518  ;;  %v1630_v38 = vrot.slane %v1629_v51, 2  ;;  %2528 = vpow2.f32 %v1601_v46  ;;  %v1573_v57 = vsub.f32 %v3229_v19, %v1558_v52  ;;  %v1574_v50 = vsub.f32 %v3227_v1, %v1558_v52 }
 0x20a   : > { %v3279_v58 = vpop.eup %2520  ;;  %v1637_v59 = vrot.slane %v1636_v53, 4  ;;  %v1643_v60 = vsel %vm3571_vm0, %v3275_v54, 0.0  ;;  %v1623_v62 = vrot.slane %v1622_v41, 1  ;;  %2530 = vrcp.f32 %v1615_v55 }
 0x20b   : > { %v1644_v61 = vsel %vm3600_vm11, %v3279_v58, 0.0  ;;  %v1603_v2 = vmul.f32 1.442695, %v1573_v57  ;;  %v1605_v43 = vmul.f32 1.442695, %v1574_v50  ;;  %v1631_v36 = vadd.f32 %v1630_v38, %v1629_v51  ;;  %vm3614_vm11 = vmmov %vm3571_vm0 }
 0x20c   : > { %v1638_v8 = vadd.f32 %v1637_v59, %v1636_v53  ;;  %v1645_v9 = vadd.f32 %v1644_v61, %v1643_v60  ;;  %v1624_v10 = vadd.f32 %v1623_v62, %v1622_v41  ;;  %v784_v56 = vadd.f32 %v3290_v33, %v3127_v7 }
 0x20d   : > { %2532 = vpow2.f32 %v1603_v2  ;;  %v1632_v19 = vrot.slane %v1631_v36, 1  ;;  %v795_v49 = vadd.f32 %v3129_v15, %v3290_v33  ;;  %v787_v51 = vadd.f32 %v3290_v33, %v3131_v16 }
 0x20e   : > { %v3285_v1 = vpop.eup %2522  ;;  %v1639_v11 = vrot.slane %v1638_v8, 2  ;;  %v1646_v32 = vrot.slane %v1645_v9, 4  ;;  %2534 = vpow2.f32 %v1605_v43  ;;  %v3314_v7 = vadd.f32 %v3133_v18, %v3290_v33 }
 0x20f   : > { %v3292_v34 = vpop.eup %2524  ;;  %v1652_v4 = vsel %vm3601_vm14, %v3285_v1, 0.0  ;;  %2536 = vrcp.f32 %v1624_v10  ;;  %v1633_v35 = vadd.f32 %v1632_v19, %v1631_v36  ;;  %v800_v53 = vadd.f32 %v3290_v33, %v3135_v20  ;;  %vm3615_vm14 = vmmov %vm3571_vm0 }
 0x210   : > { %v1647_v5 = vadd.f32 %v1646_v32, %v1645_v9  ;;  %v1653_v14 = vsel %vm3602_vm9, %v3292_v34, 0.0  ;;  %v1640_v39 = vadd.f32 %v1639_v11, %v1638_v8  ;;  %v3322_v16 = vadd.f32 %v3137_v21, %v3290_v33  ;;  %vm3616_vm9 = vmmov %vm3571_vm0 }
 0x211   : > { %v1654_v45 = vadd.f32 %v1653_v14, %v1652_v4  ;;  %2538 = vrcp.f32 %v1633_v35  ;;  %v803_v20 = vadd.f32 %v3290_v33, %v3139_v17  ;;  %v3330_v62 = vadd.f32 %v3290_v33, %v3143_v24 }
 0x212   : > { %v3302_v30 = vpop.eup %2526  ;;  %v1648_v46 = vrot.slane %v1647_v5, 2  ;;  %v1641_v47 = vrot.slane %v1640_v39, 1 }
 0x213   : > { %v3308_v52 = vpop.eup %2528  ;;  %v1655_v41 = vrot.slane %v1654_v45, 4  ;;  %v1661_v23 = vsel %vm3603_vm15, %v3302_v30, 0.0  ;;  %vm1810_vm15 = vcmask 1041409  }
 0x214   : > { %v2531_v55 = vpop.eup %2530  ;;  %v1662_v15 = vsel %vm3604_vm10, %v3308_v52, 0.0  ;;  %v1642_v38 = vadd.f32 %v1641_v47, %v1640_v39  ;;  %v1649_v57 = vadd.f32 %v1648_v46, %v1647_v5  ;;  %vm3617_vm10 = vmmov %vm3571_vm0 }
 0x215   : > { %v1656_v50 = vadd.f32 %v1655_v41, %v1654_v45  ;;  %v1663_v59 = vadd.f32 %v1662_v15, %v1661_v23  ;;  %v1687_v60 = vmul.f32 %v2531_v55, %v3233_v6  ;;  %v1688_v18 = vmul.f32 %v2531_v55, %v3239_v13 }
 0x216   : > { %2540 = vrcp.f32 %v1642_v38  ;;  %v1650_v61 = vrot.slane %v1649_v57, 1 }
 0x217   : > { %v3332_v2 = vpop.eup %2532  ;;  %v1657_v21 = vrot.slane %v1656_v50, 2  ;;  %v1664_v43 = vrot.slane %v1663_v59, 4  ;;  %v1703_v36 = vmul.f32 %v1687_v60, %v784_v56  ;;  %v1704_v8 = vmul.f32 %v1688_v18, %v787_v51 }
 0x218   : > { %v3334_v9 = vpop.eup %2534  ;;  %v1670_v6 = vsel %vm3605_vm3, %v3332_v2, 0.0  ;;  %v1900_v13 = vsel %vm3606_vm1, %v1688_v18, 0.0  ;;  %v1897_v17 = vsel %vm3607_vm7, %v1687_v60, 0.0  ;;  %v1651_v10 = vadd.f32 %v1650_v61, %v1649_v57  ;;  %vm3618_vm3 = vmmov %vm3571_vm0 }
 0x219   : > { %v2537_v19 = vpop.eup %2536  ;;  %v3340_v24 = vadd.f32 %v1664_v43, %v1663_v59  ;;  %v1671_v11 = vsel %vm3608_vm8, %v3334_v9, 0.0  ;;  %v1719_v32 = vsel %vm3609_vm4, %v1703_v36, 0.0  ;;  %v1720_v4 = vsel %vm3610_vm12, %v1704_v8, 0.0  ;;  %1901 = vadd.xlane.f32.xlu0 %v1900_v13  ;;  %1898 = vadd.xlane.f32.xlu1 %v1897_v17  ;;  %vm3619_vm1 = vmmov %vm3571_vm0 }
 0x21a   : > { %v1672_v35 = vadd.f32 %v1671_v11, %v1670_v6  ;;  %v1689_v5 = vmul.f32 %v2537_v19, %v3247_v44  ;;  %v1690_v14 = vmul.f32 %v2537_v19, %v3249_v48  ;;  %v1721_v39 = vadd.f32 %v1720_v4, %v1719_v32  ;;  %vm3620_vm7 = vmmov %vm3571_vm0 }
 0x21b   : > { %v2539_v45 = vpop.eup %2538  ;;  %v1666_v56 = vrot.slane %v3340_v24, 2  ;;  %v1658_v46 = vadd.f32 %v1657_v21, %v1656_v50  ;;  %2542 = vrcp.f32 %v1651_v10  ;;  %v819_v51 = vadd.f32 %v3290_v33, %v3147_v26  ;;  %vm3621_vm8 = vmmov %vm3571_vm0 }
 0x21c   : > { %v1673_v47 = vrot.slane %v1672_v35, 4  ;;  %v1705_v41 = vmul.f32 %v1689_v5, %v792_v40  ;;  %v1706_v23 = vmul.f32 %v1690_v14, %v795_v49  ;;  %v1722_v55 = vrot.slane %v1721_v39, 4  ;;  %vm3622_vm4 = vmmov %vm3571_vm0 }
 0x21d   : > { %v1691_v15 = vmul.f32 %v2539_v45, %v3255_v0  ;;  %v1692_v38 = vmul.f32 %v2539_v45, %v3259_v63  ;;  %v1906_v44 = vsel %vm3611_vm13, %v1690_v14, 0.0  ;;  %v1903_v48 = vsel %vm3612_vm6, %v1689_v5, 0.0  ;;  %vm3623_vm12 = vmmov %vm3571_vm0 }
 0x21e   : > { %v1674_v57 = vadd.f32 %v1673_v47, %v1672_v35  ;;  %v1728_v59 = vsel %vm3613_vm5, %v1705_v41, 0.0  ;;  %v1729_v50 = vsel %vm3571_vm0, %v1706_v23, 0.0  ;;  %v1723_v60 = vadd.f32 %v1722_v55, %v1721_v39  ;;  %1907 = vadd.xlane.f32.xlu1 %v1906_v44  ;;  %1904 = vadd.xlane.f32.xlu0 %v1903_v48  ;;  %vm3624_vm13 = vmmov %vm3571_vm0 }
 0x21f   : > { %v1730_v26 = vadd.f32 %v1729_v50, %v1728_v59  ;;  %v1707_v40 = vmul.f32 %v1691_v15, %v800_v53  ;;  %v1708_v49 = vmul.f32 %v1692_v38, %v803_v20  ;;  %v1912_v18 = vsel %vm3614_vm11, %v1692_v38, 0.0  ;;  %vm3625_vm6 = vmmov %vm3571_vm0 }
 0x220   : > { %v2541_v0 = vpop.eup %2540  ;;  %v1675_v61 = vrot.slane %v1674_v57, 2  ;;  %v1724_v63 = vrot.slane %v1723_v60, 2  ;;  %v1909_v21 = vsel %vm3615_vm14, %v1691_v15, 0.0  ;;  %v1659_v43 = vrot.slane %v1658_v46, 1  ;;  %vm3626_vm11 = vmmov %vm3619_vm1 }
 0x221   : > { %v1731_v36 = vrot.slane %v1730_v26, 4  ;;  %v1693_v8 = vmul.f32 %v2541_v0, %v3267_v37  ;;  %v1737_v6 = vsel %vm3616_vm9, %v1707_v40, 0.0  ;;  %v1694_v13 = vmul.f32 %v2541_v0, %v3269_v42  ;;  %vm3627_vm14 = vmmov %vm3619_vm1 }
 0x222   : > { %v1725_v17 = vadd.f32 %v1724_v63, %v1723_v60  ;;  %v1738_v53 = vsel %vm3617_vm10, %v1708_v49, 0.0  ;;  %1913 = vadd.xlane.f32.xlu1 %v1912_v18  ;;  %1910 = vadd.xlane.f32.xlu0 %v1909_v21  ;;  %v1660_v20 = vadd.f32 %v1659_v43, %v1658_v46  ;;  %v1676_v10 = vadd.f32 %v1675_v61, %v1674_v57  ;;  %vm3628_vm9 = vmmov %vm3619_vm1 }
 0x223   : > { %v1732_v19 = vadd.f32 %v1731_v36, %v1730_v26  ;;  %v1709_v11 = vmul.f32 %v1693_v8, %v3314_v7  ;;  %v1710_v32 = vmul.f32 %v1694_v13, %v3322_v16  ;;  %v1739_v4 = vadd.f32 %v1738_v53, %v1737_v6  ;;  %vm3629_vm10 = vmmov %vm3619_vm1 }
 0x224   : > { %v1726_v35 = vrot.slane %v1725_v17, 1  ;;  %2544 = vrcp.f32 %v1660_v20  ;;  %v1918_v37 = vsel %vm3618_vm3, %v1694_v13, 0.0  ;;  %v1915_v42 = vsel %vm3619_vm1, %v1693_v8, 0.0 }
 0x225   : > { %v2543_v5 = vpop.eup %2542  ;;  %v1733_v14 = vrot.slane %v1732_v19, 2  ;;  %v1746_v39 = vsel %vm3620_vm7, %v1709_v11, 0.0  ;;  %v1747_v45 = vsel %vm3621_vm8, %v1710_v32, 0.0  ;;  %v1740_v46 = vrot.slane %v1739_v4, 4  ;;  %vm3630_vm7 = vmmov %vm3619_vm1 }
 0x226   : > { %v1727_v47 = vadd.f32 %v1726_v35, %v1725_v17  ;;  %v1748_v41 = vadd.f32 %v1747_v45, %v1746_v39  ;;  %v1695_v7 = vmul.f32 %v2543_v5, %v3275_v54  ;;  %v1696_v16 = vmul.f32 %v2543_v5, %v3279_v58  ;;  %1919 = vadd.xlane.f32.xlu1 %v1918_v37  ;;  %vm3631_vm8 = vmmov %vm3619_vm1 }
 0x227   : > { %v1734_v23 = vadd.f32 %v1733_v14, %v1732_v19  ;;  %v1741_v55 = vadd.f32 %v1740_v46, %v1739_v4  ;;  %1916 = vadd.xlane.f32.xlu0 %v1915_v42  ;;  %v1677_v15 = vrot.slane %v1676_v10, 1  ;;  %v1667_v38 = vadd.f32 %v1666_v56, %v3340_v24 }
 0x228   : > { %v1749_v44 = vrot.slane %v1748_v41, 4  ;;  %v1711_v48 = vmul.f32 %v1695_v7, %v3330_v62  ;;  %v1712_v57 = vmul.f32 %v1696_v16, %v819_v51  ;;  %v1924_v59 = vsel %vm3622_vm4, %v1696_v16, 0.0  ;;  %vm3632_vm4 = vmmov %vm3619_vm1 }
 0x229   : > { %v1735_v50 = vrot.slane %v1734_v23, 1  ;;  %v1742_v60 = vrot.slane %v1741_v55, 2  ;;  %v1921_v26 = vsel %vm3623_vm12, %v1695_v7, 0.0  ;;  %v1678_v54 = vadd.f32 %v1677_v15, %v1676_v10  ;;  %vm3633_vm12 = vmmov %vm3619_vm1 }
 0x22a   : > { %v1750_v40 = vadd.f32 %v1749_v44, %v1748_v41  ;;  %v1755_v58 = vsel %vm3624_vm13, %v1711_v48, 0.0  ;;  %v1756_v49 = vsel %vm3625_vm6, %v1712_v57, 0.0  ;;  %1925 = vadd.xlane.f32.xlu1 %v1924_v59  ;;  %v1668_v18 = vrot.slane %v1667_v38, 1  ;;  %vm3634_vm13 = vmmov %vm3619_vm1 }
 0x22b   : > { %v1736_v0 = vadd.f32 %v1735_v50, %v1734_v23  ;;  %v1743_v24 = vadd.f32 %v1742_v60, %v1741_v55  ;;  %v1757_v56 = vadd.f32 %v1756_v49, %v1755_v58  ;;  %1922 = vadd.xlane.f32.xlu0 %v1921_v26  ;;  %2546 = vrcp.f32 %v1678_v54  ;;  %vm3635_vm6 = vmmov %vm3619_vm1 }
 0x22c   : > { %v1751_v62 = vrot.slane %v1750_v40, 2  ;;  %v1669_v51 = vadd.f32 %v1668_v18, %v1667_v38  ;;  %v824_v21 = vadd.f32 %v3141_v22, %v3290_v33  ;;  %vm1812_vm5 = vcmask 1042434  }
 0x22d   : > { %v1811_v61 = vsel %vm1810_vm15, %v1736_v0, %v1727_v47  ;;  %v1744_v63 = vrot.slane %v1743_v24, 1  ;;  %v1758_v43 = vrot.slane %v1757_v56, 4  ;;  %v827_v6 = vadd.f32 %v3145_v25, %v3290_v33 }
 0x22e   : > { %v2545_v36 = vpop.eup %2544  ;;  %v1752_v8 = vadd.f32 %v1751_v62, %v1750_v40  ;;  %2548 = vrcp.f32 %v1669_v51  ;;  %vm1814_vm0 = vcmask 1043459   ;;  %v840_v45 = vadd.f32 %v3149_v27, %v3290_v33 }
 0x22f   : > { %v1745_v13 = vadd.f32 %v1744_v63, %v1743_v24  ;;  %v1697_v17 = vmul.f32 %v2545_v36, %v3285_v1  ;;  %v1698_v53 = vmul.f32 %v2545_v36, %v3292_v34  ;;  %v1759_v20 = vadd.f32 %v1758_v43, %v1757_v56 }
 0x230   : > { %v1753_v10 = vrot.slane %v1752_v8, 1  ;;  %v843_v46 = vadd.f32 %v3153_v29, %v3290_v33  ;;  %vm1816_vm3 = vcmask 1044484   ;;  %v832_v23 = vadd.f32 %v3290_v33, %v3151_v28 }
 0x231   : > { %v1813_v19 = vsel %vm1812_vm5, %v1745_v13, %v1811_v61  ;;  %v1713_v11 = vmul.f32 %v1697_v17, %v824_v21  ;;  %v1714_v22 = vmul.f32 %v1698_v53, %v827_v6  ;;  %v1760_v32 = vrot.slane %v1759_v20, 2 }
 0x232   : > { %v1754_v4 = vadd.f32 %v1753_v10, %v1752_v8  ;;  %v1930_v35 = vsel %vm3626_vm11, %v1698_v53, 0.0  ;;  %v1927_v37 = vsel %vm3627_vm14, %v1697_v17, 0.0  ;;  %v835_v55 = vadd.f32 %v3290_v33, %v3155_v31  ;;  %vm3636_vm11 = vmmov %vm3619_vm1 }
 0x233   : > { %v1764_v25 = vsel %vm3628_vm9, %v1713_v11, 0.0  ;;  %v1765_v42 = vsel %vm3629_vm10, %v1714_v22, 0.0  ;;  %v1761_v1 = vadd.f32 %v1760_v32, %v1759_v20  ;;  %1931 = vadd.xlane.f32.xlu1 %v1930_v35  ;;  %1928 = vadd.xlane.f32.xlu0 %v1927_v37  ;;  %vm1818_vm14 = vcmask 1045509  }
 0x234   : > { %v1766_v34 = vadd.f32 %v1765_v42, %v1764_v25  ;;  %v1815_v5 = vsel %vm1814_vm0, %v1754_v4, %v1813_v19  ;;  %vm1820_vm9 = vcmask 1046534   ;;  %vm1822_vm10 = vcmask 1047559  }
 0x235   : > { %v2547_v14 = vpop.eup %2546  ;;  %v1762_v39 = vrot.slane %v1761_v1, 1  ;;  %v1978_v37 = vand.u32 127, %v851_v3 }
 0x236   : > { %v1767_v47 = vrot.slane %v1766_v34, 4  ;;  %v1701_v41 = vmul.f32 %v2547_v14, %v3332_v2  ;;  %v1702_v7 = vmul.f32 %v2547_v14, %v3334_v9 }
 0x237   : > { %v1763_v16 = vadd.f32 %v1762_v39, %v1761_v1  ;;  %v1983_v1 = vadd.s32 4294967288, %v1978_v37 }
 0x238   : > { %v2549_v15 = vpop.eup %2548  ;;  %v1768_v38 = vadd.f32 %v1767_v47, %v1766_v34  ;;  %v1717_v44 = vmul.f32 %v1701_v41, %v840_v45  ;;  %v1718_v27 = vmul.f32 %v1702_v7, %v843_v46  ;;  %v1942_v40 = vsel %vm3635_vm6, %v1702_v7, 0.0 }
 0x239   : > { %v1699_v48 = vmul.f32 %v2549_v15, %v3302_v30  ;;  %v1700_v29 = vmul.f32 %v2549_v15, %v3308_v52  ;;  %v1817_v2 = vsel %vm1816_vm3, %v1763_v16, %v1815_v5  ;;  %v1939_v18 = vsel %vm3636_vm11, %v1701_v41, 0.0 }
 0x23a   : > { %v1769_v57 = vrot.slane %v1768_v38, 2  ;;  %v1782_v9 = vsel %vm3619_vm1, %v1717_v44, 0.0  ;;  %v1783_v59 = vsel %vm3630_vm7, %v1718_v27, 0.0  ;;  %v1986_v39 = vsub.s32 %v1983_v1, %v2795_v12 }
 0x23b   : > { %v1715_v50 = vmul.f32 %v1699_v48, %v832_v23  ;;  %v1784_v28 = vadd.f32 %v1783_v59, %v1782_v9  ;;  %v1716_v60 = vmul.f32 %v1700_v29, %v835_v55  ;;  %v1936_v31 = vsel %vm3631_vm8, %v1700_v29, 0.0 }
 0x23c   : > { %v1770_v33 = vadd.f32 %v1769_v57, %v1768_v38  ;;  %1937 = vadd.xlane.f32.xlu1 %v1936_v31  ;;  %v1933_v26 = vsel %vm3632_vm4, %v1699_v48, 0.0  ;;  %v1981_v45 = vsub.s32 %v1978_v37, %v2795_v12  ;;  %vm1988_vm7 = vcmask 130112  }
 0x23d   : > { %v1773_v30 = vsel %vm3633_vm12, %v1715_v50, 0.0  ;;  %v1785_v54 = vrot.slane %v1784_v28, 4  ;;  %v1774_v52 = vsel %vm3634_vm13, %v1716_v60, 0.0  ;;  %1934 = vadd.xlane.f32.xlu0 %v1933_v26 }
 0x23e   : > { %v1771_v58 = vrot.slane %v1770_v33, 1  ;;  %v1775_v49 = vadd.f32 %v1774_v52, %v1773_v30 }
 0x23f   : > { %v1786_v0 = vadd.f32 %v1785_v54, %v1784_v28 }
 0x240   : > { %v1772_v24 = vadd.f32 %v1771_v58, %v1770_v33  ;;  %v1776_v56 = vrot.slane %v1775_v49, 4  ;;  %1943 = vadd.xlane.f32.xlu1 %v1942_v40 }
 0x241   : > { %v1787_v62 = vrot.slane %v1786_v0, 2  ;;  %1940 = vadd.xlane.f32.xlu0 %v1939_v18 }
 0x242   : > { %v1777_v51 = vadd.f32 %v1776_v56, %v1775_v49  ;;  %v1819_v61 = vsel %vm1818_vm14, %v1772_v24, %v1817_v2 }
 0x243   : > { %v1788_v63 = vadd.f32 %v1787_v62, %v1786_v0 }
 0x244   : > { %v1778_v21 = vrot.slane %v1777_v51, 2 }
 0x245   : > { %v1789_v43 = vrot.slane %v1788_v63, 1 }
 0x246   : > { %v1779_v36 = vadd.f32 %v1778_v21, %v1777_v51 }
 0x247   : > { %v1790_v6 = vadd.f32 %v1789_v43, %v1788_v63 }
 0x248   : > { %v1780_v8 = vrot.slane %v1779_v36, 1 }
 0x24a   : > { %v1781_v13 = vadd.f32 %v1780_v8, %v1779_v36 }
 0x24c   : > { %v1821_v17 = vsel %vm1820_vm9, %v1781_v13, %v1819_v61 }
 0x24d   : > { %v1823_v53 = vsel %vm1822_vm10, %v1790_v6, %v1821_v17 }
 0x24e   : > { %2402 = vmatmul.mubr.msk.f32.vlgmr.msra.gmra.mrb[2].mxu0 %vm3619_vm1, %v1823_v53 }
 0x2a6   : > { %v1902_v20 = vpop.xlane.xlu0 %1901  ;;  %v1899_v10 = vpop.xlane.xlu1 %1898 }
 0x2a7   : > { %v1946_v7 = vmul.f32 0.03125, %v1902_v20  ;;  %v1945_v16 = vmul.f32 0.03125, %v1899_v10 }
 0x2a9   : > { %v1987_v57 = vrot.slane %v1946_v7, %v1986_v39  ;;  %v1982_v9 = vrot.slane %v1945_v16, %v1981_v45 }
 0x2ab   : > { %v1908_v19 = vpop.xlane.xlu1 %1907  ;;  %v1905_v11 = vpop.xlane.xlu0 %1904  ;;  %v1989_v49 = vsel %vm1988_vm7, %v1987_v57, %v1982_v9 }
 0x2ac   : > { %v1948_v34 = vmul.f32 0.03125, %v1908_v19  ;;  %v1947_v5 = vmul.f32 0.03125, %v1905_v11 }
 0x2ae   : > { %v1997_v38 = vrot.slane %v1948_v34, %v1986_v39  ;;  %v1993_v44 = vrot.slane %v1947_v5, %v1981_v45 }
 0x2af   : > { %v1914_v22 = vpop.xlane.xlu1 %1913  ;;  %v1911_v32 = vpop.xlane.xlu0 %1910 }
 0x2b0   : > { %v1950_v46 = vmul.f32 0.03125, %v1914_v22  ;;  %v1949_v47 = vmul.f32 0.03125, %v1911_v32  ;;  %v1998_v26 = vsel %vm1988_vm7, %v1997_v38, %v1993_v44 }
 0x2b1   : > { %v2053_v56 = vsel %vm1810_vm15, %v1998_v26, %v1989_v49 }
 0x2b2   : > { %v2006_v29 = vrot.slane %v1950_v46, %v1986_v39  ;;  %v2002_v2 = vrot.slane %v1949_v47, %v1981_v45 }
 0x2b3   : > { %v1920_v4 = vpop.xlane.xlu1 %1919 }
 0x2b4   : > { %v1917_v35 = vpop.xlane.xlu0 %1916  ;;  %v1952_v23 = vmul.f32 0.03125, %v1920_v4  ;;  %v2007_v40 = vsel %vm1988_vm7, %v2006_v29, %v2002_v2 }
 0x2b5   : > { %v1951_v55 = vmul.f32 0.03125, %v1917_v35  ;;  %v2054_v63 = vsel %vm1812_vm5, %v2007_v40, %v2053_v56 }
 0x2b6   : > { %v2015_v59 = vrot.slane %v1952_v23, %v1986_v39 }
 0x2b7   : > { %v1926_v25 = vpop.xlane.xlu1 %1925  ;;  %v2011_v12 = vrot.slane %v1951_v55, %v1981_v45 }
 0x2b8   : > { %v1923_v42 = vpop.xlane.xlu0 %1922  ;;  %v1954_v15 = vmul.f32 0.03125, %v1926_v25 }
 0x2b9   : > { %v1953_v3 = vmul.f32 0.03125, %v1923_v42  ;;  %v2016_v18 = vsel %vm1988_vm7, %v2015_v59, %v2011_v12 }
 0x2ba   : > { %v2024_v28 = vrot.slane %v1954_v15, %v1986_v39  ;;  %v2055_v36 = vsel %vm1814_vm0, %v2016_v18, %v2054_v63 }
 0x2bb   : > { %v2020_v60 = vrot.slane %v1953_v3, %v1981_v45 }
 0x2bd   : > { %v2025_v62 = vsel %vm1988_vm7, %v2024_v28, %v2020_v60 }
 0x2be   : > { %v2056_v13 = vsel %vm1816_vm3, %v2025_v62, %v2055_v36 }
 0x2c0   : > { %v1932_v14 = vpop.xlane.xlu1 %1931  ;;  %v1929_v41 = vpop.xlane.xlu0 %1928 }
 0x2c1   : > { %v1956_v27 = vmul.f32 0.03125, %v1932_v14  ;;  %v1955_v48 = vmul.f32 0.03125, %v1929_v41 }
 0x2c3   : > { %v2033_v30 = vrot.slane %v1956_v27, %v1986_v39  ;;  %v2029_v54 = vrot.slane %v1955_v48, %v1981_v45 }
 0x2c5   : > { %v2034_v21 = vsel %vm1988_vm7, %v2033_v30, %v2029_v54 }
 0x2c6   : > { %v2057_v53 = vsel %vm1818_vm14, %v2034_v21, %v2056_v13 }
 0x2c9   : > { %v1938_v50 = vpop.xlane.xlu1 %1937 }
 0x2ca   : > { %v1958_v31 = vmul.f32 0.03125, %v1938_v50  ;;  %v1935_v33 = vpop.xlane.xlu0 %1934 }
 0x2cb   : > { %v1957_v52 = vmul.f32 0.03125, %v1935_v33 }
 0x2cc   : > { %v2042_v58 = vrot.slane %v1958_v31, %v1986_v39 }
 0x2cd   : > { %v2038_v0 = vrot.slane %v1957_v52, %v1981_v45  ;;  %v1944_v24 = vpop.xlane.xlu1 %1943 }
 0x2ce   : > { %v1960_v51 = vmul.f32 0.03125, %v1944_v24  ;;  %v1941_v61 = vpop.xlane.xlu0 %1940 }
 0x2cf   : > { %v1959_v43 = vmul.f32 0.03125, %v1941_v61  ;;  %v2043_v8 = vsel %vm1988_vm7, %v2042_v58, %v2038_v0 }
 0x2d0   : > { %v2051_v6 = vrot.slane %v1960_v51, %v1986_v39  ;;  %v2058_v10 = vsel %vm1820_vm9, %v2043_v8, %v2057_v53 }
 0x2d1   : > { %v2047_v17 = vrot.slane %v1959_v43, %v1981_v45 }
 0x2d3   : > { %v2052_v20 = vsel %vm1988_vm7, %v2051_v6, %v2047_v17 }
 0x2d4   : > { %v2059_v19 = vsel %vm1822_vm10, %v2052_v20, %v2058_v10 }
 0x2d5   : > { %2061 = vst.msk [vmem:[%s471_s22] sm:$0xff] %vm612_vm2, %v2059_v19 }
 0x2d6   : > { %2563 = shalt.err (!%p2560_p4)
}
 0x2d7   : > { %s2564_s22 = scalar_lea.hbm %s3444_s16, 128  ;;  %s2568_s23 = scalar_lea.hbm %s3539_s13, 256 }
 0x2d8   : > { %p2565_p7 = scmp.ne.s32.totalorder %s3444_s16, %s2564_s22  ;;  %p2569_p10 = scmp.lt.u32.totalorder %s3444_s16, %s3539_s13 }
 0x2d9   : > { %p2570_p11 = scmp.lt.u32.totalorder %s2568_s23, %s2564_s22  ;;  %p2572_p13 = scmp.lt.u32.totalorder %s2564_s22, %s3444_s16 }
 0x2da   : > { %p2566_p8 = pnand %p2565_p7, %p2763_p5 }
 0x2db   : > { %p2571_p12 = por %p2570_p11, %p2569_p10 }
 0x2dc   : > { %p2567_p9 = pneg %p2566_p8 }
 0x2dd   : > { %p2573_p0 = por %p2572_p13, %p2571_p12 }
 0x2df   : > { %p2574_p1 = pnand %p2573_p0, %p2567_p9 }
 0x2e1   : > { %2577 = shalt.err (!%p2574_p1)
}
 0x2e2   : > { %2427 = dma.vmem_to_hbm [thread:$0]  (%p2763_p5), %s3446_s20, 128, %s3444_s16, %s2068_s17   ;;  %v2258_v11 = vld [vmem:[%s3537_s11] ss:$0 sm:$0xff]  ;;  %vm3639_vm2 = vmmov %vm3619_vm1 }
 0x2e3   : > { %s3637_s0 = sshll.u32 %s3419_s21, 3  ;;  %s3638_s22 = sshll.u32 %s2746_s29, 7 }
 0x2e4   : > { %s464_s30 = scalar_lea.vmem [#allocation2], %s3637_s0  ;;  %s3482_s1 = scalar_lea.hbm %s3538_s12, %s3638_s22 }
 0x2e5   : > { %s2081_s15 = sshll.u32 %s464_s30, 4  ;;  %s2063_s20 = scalar_lea.sflag [#allocation3], %s3419_s21  ;;  %s3484_s15 = int_to_ptr.vmem [resolvable:$true] %s2081_s15 }
 0x2e6   : > { %s2578_s16 = scalar_lea.vmem %s3484_s15, 128  ;;  %s2654_s17 = smov [#allocation2]  }
 0x2e7   : > { %p2579_p2 = scmp.ne.s32.totalorder %s3484_s15, %s2578_s16  ;;  %s2582_s29 = sshll.u32 %s2654_s17, 4  ;;  %s2583_s29 = int_to_ptr.vmem [resolvable:$false] %s2582_s29 }
 0x2e8   : > { %s2584_s5 = scalar_lea.vmem %s2583_s29, 256  ;;  %p2585_p7 = scmp.lt.s32.totalorder %s3484_s15, %s2583_s29 }
 0x2e9   : > { %p2580_p3 = pnand %p2579_p2, %p2763_p5  ;;  %p2586_p8 = scmp.lt.s32.totalorder %s2584_s5, %s2578_s16 }
 0x2eb   : > { %p2581_p4 = pneg %p2580_p3  ;;  %p2587_p9 = por %p2586_p8, %p2585_p7 }
 0x2ed   : > { %p2588_p10 = pnand %p2587_p9, %p2581_p4 }
 0x321   : > { %v1892_v22 = vpop.f32.mrb[2].mxu0 }
 0x322   : > { %v1893_v32 = vadd.f32 %v2258_v11, %v1892_v22  ;;  %v2403_v4 = vpop.f32.mrb[3].mxu0 }
 0x324   : > { %1896 = vst.msk [vmem:[%s464_s30] sm:$0xff] %vm3639_vm2, %v1893_v32 }
 0x325   : > { %2591 = shalt.err (!%p2588_p10)
}
 0x326   : > { %s2592_s21 = scalar_lea.hbm %s3482_s1, 128  ;;  %s2596_s30 = scalar_lea.hbm %s3538_s12, 256 }
 0x327   : > { %p2593_p11 = scmp.ne.s32.totalorder %s3482_s1, %s2592_s21  ;;  %p2597_p0 = scmp.lt.u32.totalorder %s3482_s1, %s3538_s12 }
 0x328   : > { %p2598_p1 = scmp.lt.u32.totalorder %s2596_s30, %s2592_s21  ;;  %p2600_p3 = scmp.lt.u32.totalorder %s2592_s21, %s3482_s1 }
 0x329   : > { %p2594_p12 = pnand %p2593_p11, %p2763_p5 }
 0x32a   : > { %p2599_p2 = por %p2598_p1, %p2597_p0 }
 0x32b   : > { %p2595_p13 = pneg %p2594_p12 }
 0x32c   : > { %p2601_p4 = por %p2600_p3, %p2599_p2 }
 0x32e   : > { %p2602_p7 = pnand %p2601_p4, %p2595_p13 }
 0x330   : > { %2605 = shalt.err (!%p2602_p7)
}
 0x331   : > { %2426 = dma.vmem_to_hbm [thread:$0]  (%p2763_p5), %s3484_s15, 128, %s3482_s1, %s2063_s20  }
 0x332 PF: > { %p2437_p8 = scmp.ge.s32.totalorder %s2644_s28, 2  ;;  %s2106_s24 = sand.u32 1, %s2632_s25  }
 0x333   : > { %s2107_s16 = scalar_lea.sflag [#allocation3], %s2106_s24 }
 0x334   : > { %p2431_p9 = pnand %p2437_p8, %p2767_p6 }
 0x336   : > { %2623 = dma.done.wait (!%p2431_p9), %s2107_s16, 128  }
 0x337   : > { %2625 = vsyncadd (!%p2431_p9), %s2107_s16, 4294967168  ;;  %s2116_s17 = scalar_lea.sflag [#allocation5], %s2106_s24 }
 0x338   : > { %2627 = dma.done.wait (!%p2431_p9), %s2116_s17, 128  }
 0x339   : > { %2629 = vsyncadd (!%p2431_p9), %s2116_s17, 4294967168  ;;  %s3640_s18 = sld [smem:[#allocation8_spill]]  ;;  %p27_p5 = scmp.ge.s32.totalorder %s2750_s14, 4  }
 0x33a   : > { %s3641_s25 = smov %s2636_s26  ;;  %s3642_s26 = smov %s2640_s27 }
 0x33b   : > { %s3644_s28 = smov %s2750_s14  ;;  %29 = sbr.rel (!%p27_p5) target bundleno = 10 (0xa), region = 126 }
 0x33f   : > { %s3643_s27 = smov %s3640_s18 }
 0x342   :  { %2121 = vsyncpa [#allocation3], 1 }
 0x343   :  { %2123 = vsyncpa [#allocation3 + $0x1], 1 }
 0x344   :  { %2124 = vsyncpa [#allocation5], 1 }
 0x345   :  { %2126 = vsyncpa [#allocation5 + $0x1], 1 }

</bundles_post_ra>
